<compile_context>
chip_gen: v7x
topology: tpu7x:2x2x1
jax: 0.10.0
libtpu: 0.0.40
codegen_flags: <defaults>
</compile_context>

<pallas_src>
import functools

import jax
import jax.numpy as jnp
from jax import lax
from jax.experimental import pallas as pl
from jax.experimental.pallas import tpu as pltpu


def _round_up(a, b):
    return (a + b - 1) // b * b


def _conv_bn_relu_kernel(xmain_ref, xhalo_ref, w_ref, scale_ref, shift_ref,
                         o_ref, xtile_ref, acc_ref, *, dilation, th, wp, tco):
    # xmain_ref : (1, th*wp, Cin)        bf16  row tile (flattened rows x padded cols)
    # xhalo_ref : (1, 2*d*wp, Cin)       bf16  halo rows just below the tile
    # w_ref     : (3, 1, Cin, 3*tco)     bf16  per-ky weights, 3 kx taps folded into N
    # scale_ref : (1, tco)               f32   gamma / sqrt(var + eps)
    # shift_ref : (1, tco)               f32   beta - mean*scale + bias*scale
    # o_ref     : (1, th*wp, tco)              output tile (flattened, padded width)
    # xtile_ref : ((th+2d)*wp, Cin)      bf16  VMEM scratch (tile + halo, contiguous)
    # acc_ref   : (th*wp, tco)           f32   VMEM accumulator
    d = dilation
    m = th * wp
    halo = 2 * d * wp

    # Stitch row tile + halo into one contiguous VMEM buffer.
    xtile_ref[pl.ds(0, m), :] = xmain_ref[0]
    xtile_ref[pl.ds(m, halo), :] = xhalo_ref[0]

    for ky in range(3):
        # (m, Cin) slab shifted down by ky*d rows: a contiguous, aligned
        # leading-dim slice of the scratch (no strided reshape).
        slab = xtile_ref[pl.ds(ky * d * wp, m), :]
        # One MXU matmul per ky: K = Cin, N = 3*tco (all three kx taps at once).
        z = jnp.dot(slab, w_ref[ky, 0], preferred_element_type=jnp.float32)

        contrib = z[:, 0:tco]                       # kx = 0, no shift
        for kx in (1, 2):
            zk = z[:, kx * tco:(kx + 1) * tco]
            # output row p needs z[p + kx*d] -> roll "up" by kx*d (XLU rotate).
            contrib = contrib + pltpu.roll(zk, shift=m - kx * d, axis=0)

        if ky == 0:
            acc_ref[...] = contrib
        else:
            acc_ref[...] = acc_ref[...] + contrib

    # Fused BN (eval) + ReLU epilogue in f32; lane-dense store.
    y = acc_ref[...] * scale_ref[...] + shift_ref[...]
    o_ref[0] = jnp.maximum(y, 0.0).astype(o_ref.dtype)


def conv_block_forward(x_nchw, weight, bias, gamma, beta, running_mean,
                       running_var, *, dilation=1, eps=1e-5):
    """Fused Conv2d(3x3, stride=1, pad=dilation, dilation) + BN(eval) + ReLU.

    x_nchw: (N, Cin, H, W), weight: (Cout, Cin, 3, 3) -> (N, Cout, H, W)
    """
    N, Cin, H, W = x_nchw.shape
    Cout = weight.shape[0]
    d = int(dilation)

    # ---- tiling parameters ----
    LANE = 128
    cout_p = _round_up(Cout, LANE)                 # lane-dense channel padding
    tco = 256 if cout_p % 256 == 0 else LANE       # Cout tile
    n_j = cout_p // tco
    th = _round_up(8, 2 * d)                       # output rows per tile (mult of 2d)
    h_pad = _round_up(H, th)
    wp = _round_up(W + 2 * d, 16)                  # padded width (bf16 sublane aligned)
    n_i = h_pad // th
    m = th * wp
    halo_blk = th // (2 * d)                       # halo block index multiplier

    # ---- input: NCHW -> zero-padded, flattened NHWC, bf16 ----
    x = jnp.transpose(x_nchw, (0, 2, 3, 1))                                  # (N,H,W,Cin)
    x = jnp.pad(x, ((0, 0), (d, h_pad - H + d), (d, wp - W - d), (0, 0)))    # (N,h_pad+2d,wp,Cin)
    x = x.reshape(N, (h_pad + 2 * d) * wp, Cin).astype(jnp.bfloat16)

    # ---- weights: (Cout,Cin,3,3) -> (3, n_j, Cin, 3*tco), kx folded into N dim ----
    w = jnp.transpose(weight, (2, 1, 3, 0))                                  # (ky,ci,kx,co)
    w = jnp.pad(w, ((0, 0), (0, 0), (0, 0), (0, cout_p - Cout)))
    w = w.reshape(3, Cin, 3, n_j, tco)
    w = jnp.transpose(w, (0, 3, 1, 2, 4)).reshape(3, n_j, Cin, 3 * tco)
    w = w.astype(jnp.bfloat16)

    # ---- fold conv bias + eval-mode BN into per-channel scale/shift ----
    scale = (gamma / jnp.sqrt(running_var + eps)).astype(jnp.float32)
    shift = (beta - running_mean * scale + bias * scale).astype(jnp.float32)
    scale = jnp.pad(scale, (0, cout_p - Cout)).reshape(1, cout_p)
    shift = jnp.pad(shift, (0, cout_p - Cout)).reshape(1, cout_p)

    kernel = functools.partial(_conv_bn_relu_kernel,
                               dilation=d, th=th, wp=wp, tco=tco)

    out_flat = pl.pallas_call(
        kernel,
        out_shape=jax.ShapeDtypeStruct((N, h_pad * wp, cout_p), x_nchw.dtype),
        grid_spec=pltpu.PrefetchScalarGridSpec(
            num_scalar_prefetch=0,
            grid=(N, n_i, n_j),
            in_specs=[
                # th-row tile of the padded image, flattened to (th*wp, Cin)
                pl.BlockSpec((1, m, Cin), lambda n, i, j: (n, i, 0)),
                # 2*d-row halo immediately below the tile
                pl.BlockSpec((1, 2 * d * wp, Cin),
                             lambda n, i, j: (n, (i + 1) * halo_blk, 0)),
                pl.BlockSpec((3, 1, Cin, 3 * tco), lambda n, i, j: (0, j, 0, 0)),
                pl.BlockSpec((1, tco), lambda n, i, j: (0, j)),
                pl.BlockSpec((1, tco), lambda n, i, j: (0, j)),
            ],
            out_specs=pl.BlockSpec((1, m, tco), lambda n, i, j: (n, i, j)),
            scratch_shapes=[
                pltpu.VMEM(((th + 2 * d) * wp, Cin), jnp.bfloat16),
                pltpu.VMEM((m, tco), jnp.float32),
            ],
        ),
        compiler_params=pltpu.CompilerParams(
            dimension_semantics=("parallel", "parallel", "arbitrary"),
            vmem_limit_bytes=48 * 1024 * 1024,
        ),
    )(x, x, w, scale, shift)

    out = out_flat.reshape(N, h_pad, wp, cout_p)[:, :H, :W, :Cout]
    return jnp.transpose(out, (0, 3, 1, 2))                                  # (N,Cout,H,W)


def _reference_forward(x, weight, bias, gamma, beta, rmean, rvar,
                       *, dilation=1, eps=1e-5):
    """Pure-JAX reference (lax conv) for correctness check."""
    d = int(dilation)
    y = lax.conv_general_dilated(
        x.astype(jnp.float32), weight.astype(jnp.float32),
        window_strides=(1, 1), padding=((d, d), (d, d)),
        rhs_dilation=(d, d),
        dimension_numbers=("NCHW", "OIHW", "NCHW"))
    y = y + bias.reshape(1, -1, 1, 1)
    y = (y - rmean.reshape(1, -1, 1, 1)) / jnp.sqrt(rvar.reshape(1, -1, 1, 1) + eps)
    y = y * gamma.reshape(1, -1, 1, 1) + beta.reshape(1, -1, 1, 1)
    return jnp.maximum(y, 0.0)


def _run_case(key, N, Cin, Cout, H, W, dilation):
    k_x, k_w, k_b, k_g, k_be, k_m, k_v = jax.random.split(key, 7)
    x = jax.random.normal(k_x, (N, Cin, H, W), dtype=jnp.float32)
    weight = jax.random.normal(k_w, (Cout, Cin, 3, 3), dtype=jnp.float32) * 0.1
    bias = jax.random.normal(k_b, (Cout,), dtype=jnp.float32) * 0.1
    gamma = 1.0 + 0.1 * jax.random.normal(k_g, (Cout,), dtype=jnp.float32)
    beta = 0.1 * jax.random.normal(k_be, (Cout,), dtype=jnp.float32)
    rmean = 0.1 * jax.random.normal(k_m, (Cout,), dtype=jnp.float32)
    rvar = jnp.abs(1.0 + 0.1 * jax.random.normal(k_v, (Cout,), dtype=jnp.float32))

    out = conv_block_forward(x, weight, bias, gamma, beta, rmean, rvar,
                             dilation=dilation)
    out = jax.block_until_ready(out)
    ref = _reference_forward(x, weight, bias, gamma, beta, rmean, rvar,
                             dilation=dilation)
    assert out.shape == (N, Cout, H, W)
    err = float(jnp.max(jnp.abs(out - ref)))
    # bf16 matmul operands -> looser tolerance than pure-f32.
    assert err < 5e-2, f"mismatch vs reference conv: max abs err = {err}"


if __name__ == "__main__":
    key = jax.random.PRNGKey(0)
    k1, k2 = jax.random.split(key, 2)

    # Required small config (matches the module defaults): dilation=1.
    _run_case(k1, N=2, Cin=4, Cout=8, H=16, W=16, dilation=1)

    # Extra coverage: dilation=2, non-aligned H/W, multiple Cout tiles (n_j > 1).
    _run_case(k2, N=1, Cin=5, Cout=260, H=10, W=13, dilation=2)

    print("KERNEL_OK")
</pallas_src>

<mosaic_0001>
module attributes {stable_mosaic.version = 11 : i64} {
  func.func @_conv_bn_relu_kernel(%arg0: i32, %arg1: i32, %arg2: i32, %arg3: memref<1x256x4xbf16, #tpu.memory_space<vmem>>, %arg4: memref<1x64x4xbf16, #tpu.memory_space<vmem>>, %arg5: memref<3x1x4x384xbf16, #tpu.memory_space<vmem>>, %arg6: memref<1x128xf32, #tpu.memory_space<vmem>>, %arg7: memref<1x128xf32, #tpu.memory_space<vmem>>, %arg8: memref<1x256x128xf32, #tpu.memory_space<vmem>>, %arg9: memref<320x4xbf16, #tpu.memory_space<vmem>>, %arg10: memref<256x128xf32, #tpu.memory_space<vmem>>) attributes {dimension_semantics = [#tpu.dimension_semantics<parallel>, #tpu.dimension_semantics<parallel>, #tpu.dimension_semantics<arbitrary>], iteration_bounds = array<i64: 2, 2, 1>, scalar_prefetch = 0 : i64, scratch_operands = 2 : i64, tpu.core_type = #tpu.core_type<tc>, window_params = [{transform_indices = @transform_0, window_bounds = array<i64: 1, 256, 4>}, {transform_indices = @transform_1, window_bounds = array<i64: 1, 64, 4>}, {transform_indices = @transform_2, window_bounds = array<i64: 3, 1, 4, 384>}, {transform_indices = @transform_3, window_bounds = array<i64: 1, 128>}, {transform_indices = @transform_4, window_bounds = array<i64: 1, 128>}, {transform_indices = @transform_5, window_bounds = array<i64: 1, 256, 128>}]} {
    %c0 = arith.constant 0 : index
    %c0_0 = arith.constant 0 : index
    %c0_1 = arith.constant 0 : index
    %0 = vector.load %arg3[%c0, %c0_0, %c0_1] : memref<1x256x4xbf16, #tpu.memory_space<vmem>>, vector<1x256x4xbf16>
    %1 = vector.shape_cast %0 : vector<1x256x4xbf16> to vector<256x4xbf16>
    %c0_2 = arith.constant 0 : index
    %c0_3 = arith.constant 0 : index
    %2 = vector.load %arg9[%c0_2, %c0_3] : memref<320x4xbf16, #tpu.memory_space<vmem>>, vector<256x4xbf16>
    tpu.vector_store %arg9[%c0_2, %c0_3], %1 {strides = array<i32>} : memref<320x4xbf16, #tpu.memory_space<vmem>>, vector<256x4xbf16>,
    %c0_4 = arith.constant 0 : index
    %c0_5 = arith.constant 0 : index
    %c0_6 = arith.constant 0 : index
    %3 = vector.load %arg4[%c0_4, %c0_5, %c0_6] : memref<1x64x4xbf16, #tpu.memory_space<vmem>>, vector<1x64x4xbf16>
    %4 = vector.shape_cast %3 : vector<1x64x4xbf16> to vector<64x4xbf16>
    %c256 = arith.constant 256 : index
    %c0_7 = arith.constant 0 : index
    %5 = vector.load %arg9[%c256, %c0_7] : memref<320x4xbf16, #tpu.memory_space<vmem>>, vector<64x4xbf16>
    tpu.vector_store %arg9[%c256, %c0_7], %4 {strides = array<i32>} : memref<320x4xbf16, #tpu.memory_space<vmem>>, vector<64x4xbf16>,
    %c0_8 = arith.constant 0 : index
    %c0_9 = arith.constant 0 : index
    %6 = vector.load %arg9[%c0_8, %c0_9] : memref<320x4xbf16, #tpu.memory_space<vmem>>, vector<256x4xbf16>
    %c0_10 = arith.constant 0 : index
    %c0_11 = arith.constant 0 : index
    %c0_12 = arith.constant 0 : index
    %c0_13 = arith.constant 0 : index
    %7 = vector.load %arg5[%c0_10, %c0_11, %c0_12, %c0_13] : memref<3x1x4x384xbf16, #tpu.memory_space<vmem>>, vector<1x1x4x384xbf16>
    %8 = vector.shape_cast %7 : vector<1x1x4x384xbf16> to vector<4x384xbf16>
    %cst = arith.constant dense<0.000000e+00> : vector<256x384xf32>
    %9 = tpu.matmul %6, %8, %cst {dimension_numbers = #tpu.dot_dimension_numbers<[1], [0], [0], [1], [0, 0, 1, 1], [], []>} : vector<256x4xbf16>, vector<4x384xbf16>, vector<256x384xf32> -> vector<256x384xf32>
    %10 = vector.extract_strided_slice %9 {offsets = [0, 0], sizes = [256, 128], strides = [1, 1]} : vector<256x384xf32> to vector<256x128xf32>
    %11 = vector.extract_strided_slice %9 {offsets = [0, 128], sizes = [256, 128], strides = [1, 1]} : vector<256x384xf32> to vector<256x128xf32>
    %c255_i32 = arith.constant 255 : i32
    %12 = tpu.dynamic_rotate %11 by %c255_i32 dim 0 : vector<256x128xf32>, i32 -> vector<256x128xf32>
    %13 = arith.addf %10, %12 : vector<256x128xf32>
    %14 = vector.extract_strided_slice %9 {offsets = [0, 256], sizes = [256, 128], strides = [1, 1]} : vector<256x384xf32> to vector<256x128xf32>
    %c254_i32 = arith.constant 254 : i32
    %15 = tpu.dynamic_rotate %14 by %c254_i32 dim 0 : vector<256x128xf32>, i32 -> vector<256x128xf32>
    %16 = arith.addf %13, %15 : vector<256x128xf32>
    %c0_14 = arith.constant 0 : index
    %c0_15 = arith.constant 0 : index
    %17 = vector.load %arg10[%c0_14, %c0_15] : memref<256x128xf32, #tpu.memory_space<vmem>>, vector<256x128xf32>
    tpu.vector_store %arg10[%c0_14, %c0_15], %16 {strides = array<i32>} : memref<256x128xf32, #tpu.memory_space<vmem>>, vector<256x128xf32>,
    %c32 = arith.constant 32 : index
    %c0_16 = arith.constant 0 : index
    %18 = vector.load %arg9[%c32, %c0_16] : memref<320x4xbf16, #tpu.memory_space<vmem>>, vector<256x4xbf16>
    %c1 = arith.constant 1 : index
    %c0_17 = arith.constant 0 : index
    %c0_18 = arith.constant 0 : index
    %c0_19 = arith.constant 0 : index
    %19 = vector.load %arg5[%c1, %c0_17, %c0_18, %c0_19] : memref<3x1x4x384xbf16, #tpu.memory_space<vmem>>, vector<1x1x4x384xbf16>
    %20 = vector.shape_cast %19 : vector<1x1x4x384xbf16> to vector<4x384xbf16>
    %cst_20 = arith.constant dense<0.000000e+00> : vector<256x384xf32>
    %21 = tpu.matmul %18, %20, %cst_20 {dimension_numbers = #tpu.dot_dimension_numbers<[1], [0], [0], [1], [0, 0, 1, 1], [], []>} : vector<256x4xbf16>, vector<4x384xbf16>, vector<256x384xf32> -> vector<256x384xf32>
    %22 = vector.extract_strided_slice %21 {offsets = [0, 0], sizes = [256, 128], strides = [1, 1]} : vector<256x384xf32> to vector<256x128xf32>
    %23 = vector.extract_strided_slice %21 {offsets = [0, 128], sizes = [256, 128], strides = [1, 1]} : vector<256x384xf32> to vector<256x128xf32>
    %c255_i32_21 = arith.constant 255 : i32
    %24 = tpu.dynamic_rotate %23 by %c255_i32_21 dim 0 : vector<256x128xf32>, i32 -> vector<256x128xf32>
    %25 = arith.addf %22, %24 : vector<256x128xf32>
    %26 = vector.extract_strided_slice %21 {offsets = [0, 256], sizes = [256, 128], strides = [1, 1]} : vector<256x384xf32> to vector<256x128xf32>
    %c254_i32_22 = arith.constant 254 : i32
    %27 = tpu.dynamic_rotate %26 by %c254_i32_22 dim 0 : vector<256x128xf32>, i32 -> vector<256x128xf32>
    %28 = arith.addf %25, %27 : vector<256x128xf32>
    %c0_23 = arith.constant 0 : index
    %c0_24 = arith.constant 0 : index
    %29 = vector.load %arg10[%c0_23, %c0_24] : memref<256x128xf32, #tpu.memory_space<vmem>>, vector<256x128xf32>
    %30 = arith.addf %29, %28 : vector<256x128xf32>
    %c0_25 = arith.constant 0 : index
    %c0_26 = arith.constant 0 : index
    %31 = vector.load %arg10[%c0_25, %c0_26] : memref<256x128xf32, #tpu.memory_space<vmem>>, vector<256x128xf32>
    tpu.vector_store %arg10[%c0_25, %c0_26], %30 {strides = array<i32>} : memref<256x128xf32, #tpu.memory_space<vmem>>, vector<256x128xf32>,
    %c64 = arith.constant 64 : index
    %c0_27 = arith.constant 0 : index
    %32 = vector.load %arg9[%c64, %c0_27] : memref<320x4xbf16, #tpu.memory_space<vmem>>, vector<256x4xbf16>
    %c2 = arith.constant 2 : index
    %c0_28 = arith.constant 0 : index
    %c0_29 = arith.constant 0 : index
    %c0_30 = arith.constant 0 : index
    %33 = vector.load %arg5[%c2, %c0_28, %c0_29, %c0_30] : memref<3x1x4x384xbf16, #tpu.memory_space<vmem>>, vector<1x1x4x384xbf16>
    %34 = vector.shape_cast %33 : vector<1x1x4x384xbf16> to vector<4x384xbf16>
    %cst_31 = arith.constant dense<0.000000e+00> : vector<256x384xf32>
    %35 = tpu.matmul %32, %34, %cst_31 {dimension_numbers = #tpu.dot_dimension_numbers<[1], [0], [0], [1], [0, 0, 1, 1], [], []>} : vector<256x4xbf16>, vector<4x384xbf16>, vector<256x384xf32> -> vector<256x384xf32>
    %36 = vector.extract_strided_slice %35 {offsets = [0, 0], sizes = [256, 128], strides = [1, 1]} : vector<256x384xf32> to vector<256x128xf32>
    %37 = vector.extract_strided_slice %35 {offsets = [0, 128], sizes = [256, 128], strides = [1, 1]} : vector<256x384xf32> to vector<256x128xf32>
    %c255_i32_32 = arith.constant 255 : i32
    %38 = tpu.dynamic_rotate %37 by %c255_i32_32 dim 0 : vector<256x128xf32>, i32 -> vector<256x128xf32>
    %39 = arith.addf %36, %38 : vector<256x128xf32>
    %40 = vector.extract_strided_slice %35 {offsets = [0, 256], sizes = [256, 128], strides = [1, 1]} : vector<256x384xf32> to vector<256x128xf32>
    %c254_i32_33 = arith.constant 254 : i32
    %41 = tpu.dynamic_rotate %40 by %c254_i32_33 dim 0 : vector<256x128xf32>, i32 -> vector<256x128xf32>
    %42 = arith.addf %39, %41 : vector<256x128xf32>
    %c0_34 = arith.constant 0 : index
    %c0_35 = arith.constant 0 : index
    %43 = vector.load %arg10[%c0_34, %c0_35] : memref<256x128xf32, #tpu.memory_space<vmem>>, vector<256x128xf32>
    %44 = arith.addf %43, %42 : vector<256x128xf32>
    %c0_36 = arith.constant 0 : index
    %c0_37 = arith.constant 0 : index
    %45 = vector.load %arg10[%c0_36, %c0_37] : memref<256x128xf32, #tpu.memory_space<vmem>>, vector<256x128xf32>
    tpu.vector_store %arg10[%c0_36, %c0_37], %44 {strides = array<i32>} : memref<256x128xf32, #tpu.memory_space<vmem>>, vector<256x128xf32>,
    %c0_38 = arith.constant 0 : index
    %c0_39 = arith.constant 0 : index
    %46 = vector.load %arg10[%c0_38, %c0_39] : memref<256x128xf32, #tpu.memory_space<vmem>>, vector<256x128xf32>
    %c0_40 = arith.constant 0 : index
    %c0_41 = arith.constant 0 : index
    %47 = vector.load %arg6[%c0_40, %c0_41] : memref<1x128xf32, #tpu.memory_space<vmem>>, vector<1x128xf32>
    %48 = vector.broadcast %47 : vector<1x128xf32> to vector<256x128xf32>
    %49 = arith.mulf %46, %48 : vector<256x128xf32>
    %c0_42 = arith.constant 0 : index
    %c0_43 = arith.constant 0 : index
    %50 = vector.load %arg7[%c0_42, %c0_43] : memref<1x128xf32, #tpu.memory_space<vmem>>, vector<1x128xf32>
    %51 = vector.broadcast %50 : vector<1x128xf32> to vector<256x128xf32>
    %52 = arith.addf %49, %51 : vector<256x128xf32>
    %cst_44 = arith.constant 0.000000e+00 : f32
    %53 = vector.broadcast %cst_44 : f32 to vector<256x128xf32>
    %54 = arith.maximumf %52, %53 : vector<256x128xf32>
    %c0_45 = arith.constant 0 : index
    %c0_46 = arith.constant 0 : index
    %c0_47 = arith.constant 0 : index
    %55 = vector.load %arg8[%c0_45, %c0_46, %c0_47] : memref<1x256x128xf32, #tpu.memory_space<vmem>>, vector<1x256x128xf32>
    %56 = vector.shape_cast %55 : vector<1x256x128xf32> to vector<256x128xf32>
    %57 = vector.shape_cast %54 : vector<256x128xf32> to vector<1x256x128xf32>
    tpu.vector_store %arg8[%c0_45, %c0_46, %c0_47], %57 {strides = array<i32>} : memref<1x256x128xf32, #tpu.memory_space<vmem>>, vector<1x256x128xf32>,
    return
  }
  func.func @transform_0(%arg0: i32, %arg1: i32, %arg2: i32) -> (i32, i32, i32) {
    %c0_i32 = arith.constant 0 : i32
    %c0_i32_0 = arith.constant 0 : i32
    return %arg0, %arg1, %c0_i32 : i32, i32, i32
  }
  func.func @transform_1(%arg0: i32, %arg1: i32, %arg2: i32) -> (i32, i32, i32) {
    %c1_i32 = arith.constant 1 : i32
    %0 = arith.addi %arg1, %c1_i32 : i32
    %c4_i32 = arith.constant 4 : i32
    %1 = arith.muli %0, %c4_i32 : i32
    %c0_i32 = arith.constant 0 : i32
    %c0_i32_0 = arith.constant 0 : i32
    return %arg0, %1, %c0_i32 : i32, i32, i32
  }
  func.func @transform_2(%arg0: i32, %arg1: i32, %arg2: i32) -> (i32, i32, i32, i32) {
    %c0_i32 = arith.constant 0 : i32
    %c0_i32_0 = arith.constant 0 : i32
    %c0_i32_1 = arith.constant 0 : i32
    %c0_i32_2 = arith.constant 0 : i32
    return %c0_i32, %arg2, %c0_i32_0, %c0_i32_1 : i32, i32, i32, i32
  }
  func.func @transform_3(%arg0: i32, %arg1: i32, %arg2: i32) -> (i32, i32) {
    %c0_i32 = arith.constant 0 : i32
    %c0_i32_0 = arith.constant 0 : i32
    return %c0_i32, %arg2 : i32, i32
  }
  func.func @transform_4(%arg0: i32, %arg1: i32, %arg2: i32) -> (i32, i32) {
    %c0_i32 = arith.constant 0 : i32
    %c0_i32_0 = arith.constant 0 : i32
    return %c0_i32, %arg2 : i32, i32
  }
  func.func @transform_5(%arg0: i32, %arg1: i32, %arg2: i32) -> (i32, i32, i32) {
    %c0_i32 = arith.constant 0 : i32
    return %arg0, %arg1, %arg2 : i32, i32, i32
  }
}

</mosaic_0001>

<bundles_post_ra>
// kernel: tpu_custom_call.1
= control target key start
LH: loop header
LB: loop body
LE: loop exit
PB: predicated region body
PF: predicated region fallthrough
CT: control target
= control target key end

     0   :  { %10 = vsyncpa [#allocation5], 0  ;;  %s5063_s0 = inlined_call_operand.vmem [shape: bf16[2,576,4], index: 0, kind: input, shape index: {}]   ;;  %s5064_s1 = inlined_call_operand.vmem [shape: bf16[2,576,4], index: 1, kind: input, shape index: {}]   ;;  %s5065_s2 = inlined_call_operand.vmem [shape: bf16[3,1,4,384], index: 2, kind: input, shape index: {}]   ;;  %s5066_s3 = inlined_call_operand.vmem [shape: f32[1,128], index: 3, kind: input, shape index: {}]   ;;  %s5067_s4 = inlined_call_operand.vmem [shape: f32[1,128], index: 4, kind: input, shape index: {}]   ;;  %s5068_s5 = inlined_call_operand.hbm [shape: f32[2,512,128], index: 5, kind: output, shape index: {}]  }
   0x1   :  { %12 = vsyncpa [#allocation5 + $0x1], 0  ;;  %s3581_s18 = smov 0   ;;  %s3583_s19 = smov 0  }
   0x2   :  { %s3585_s20 = smov 0   ;;  %s3587_s21 = smov 0  }
   0x3   :  { %s3589_s22 = smov 0   ;;  %s3591_s23 = smov 0  }
   0x4   :  { %s3593_s24 = smov 0   ;;  %s3595_s25 = smov 0  }
   0x5 LB: > { %s3039_s26 = sadd.s32 4294967295, %s3544_s25   ;;  %s3040_s27 = sadd.s32 4294967294, %s3544_s25   ;;  %s3544_s25 = sphi %s3595_s25, %s18_s25   ;;  %s3540_s24 = sphi %s3593_s24, %s5108_s24   ;;  %s3536_s23 = sphi %s3591_s23, %s5107_s23   ;;  %s3532_s22 = sphi %s3589_s22, %s5106_s22   ;;  %s3528_s21 = sphi %s3587_s21, %s5105_s21   ;;  %s3524_s20 = sphi %s3585_s20, %s5104_s20   ;;  %s3520_s19 = sphi %s3583_s19, %s5103_s19   ;;  %s3516_s18 = sphi %s3581_s18, %s5102_s18  }
   0x6   : > { %s33_s28 = sadd.s32 1, %s3536_s23  ;;  %s37_s29 = sadd.s32 1, %s3540_s24 }
   0x7   : > { %p35_p0 = scmp.ge.s32.totalorder %s33_s28, 2  ;;  %p196_p1 = scmp.ne.s32.totalorder %s3524_s20, %s3520_s19 }
   0x8   : > { %p197_p2 = scmp.eq.s32.totalorder %s3039_s26, 3  ;;  %p202_p5 = scmp.ne.s32.totalorder %s3520_s19, %s3516_s18 }
   0x9   : > { %s5110_s28 = smov (%p35_p0, %s33_s28), 0  ;;  %s5112_s29 = smov (!%p35_p0, %s37_s29), %s3540_s24 }
   0xa   : > { %s180_s30 = ssub.s32 %s3536_s23, %s5110_s28  ;;  %p3632_p3 = por %p197_p2, %p196_p1 }
   0xb   : > { %p39_p4 = scmp.ge.s32.totalorder %s5112_s29, 2  ;;  %p203_p6 = scmp.eq.s32.totalorder %s3040_s27, 3 }
   0xc   : > { %p3048_p7 = scmp.ge.s32.totalorder %s3544_s25, 1  ;;  %p279_p9 = scmp.lt.s32.totalorder %s3544_s25, 5 }
   0xd   : > { %s5114_s29 = smov (%p39_p4, %s5112_s29), 0  ;;  %p3641_p8 = por %p203_p6, %p202_p5 }
   0xe   : > { %s179_s8 = ssub.s32 %s3540_s24, %s5114_s29  ;;  %s186_s9 = sadd.s32 1, %s3524_s20 }
   0xf   : > { %s181_s10 = sor.u32 %s180_s30, %s179_s8  ;;  %p280_p10 = pnand %p3048_p7, %p279_p9 }
  0x10   : > { %p184_p11 = scmp.eq.s32.totalorder %s181_s10, 0 }
  0x11   : > { %283 = sbr.rel (%p280_p10) target bundleno = 576 (0x240), region = 40 }
  0x12   : > { %s3650_s11 = scalar_select %p184_p11, %s3524_s20, %s186_s9  }
  0x18   : > { %v585_v0 = vlaneseq  ;;  %v3546_v1 = vmov 1983009808   ;;  %v3547_v3 = vmov 0   ;;  %v3108_v4 = vld [vmem:[%s5065_s2 + $0x6] sm:$0x3f]  ;;  %s3658_s14 = sshll.u32 %s3528_s21, 5 }
  0x19   : > { %v583_v2 = vunpack.c.l.s4 %v3546_v1  ;;  %687 = vmatprep.mubr.bf16.mxu0 %v3547_v3  ;;  %807 = vmatprep.mubr.bf16.mxu1 %v3547_v3  ;;  %p342_p12 = scmp.lt.s32.totalorder %s3532_s22, 1  ;;  %p344_p13 = scmp.lt.s32.totalorder %s3658_s14, 71  ;;  %v579_v7 = vld [vmem:[%s5065_s2] sm:$0x3f]  ;;  %v1256_v8 = vcombine.high %v3108_v4, %v3108_v4  ;;  %vm645_vm0 = vcmask 1041408   ;;  %vm510_vm1 = vcmask 31744  }
  0x1a   : > { %v3661_v5 = vshrl.u32 %v585_v0, 7  ;;  %v581_v9 = vcombine.high %v579_v7, %v579_v7  ;;  %v3678_v11 = vld [vmem:[%s5065_s2 + $0xc] sm:$0x3f]  ;;  %s3192_s16 = sadd.s32 32, %s3658_s14  ;;  %s3548_s10 = smov [#allocation4]  }
  0x1b   : > { %v584_v6 = vunpack.c.0.s8 %v583_v2  ;;  %s3665_s15 = scalar_select %p342_p12, %s3532_s22, 1  ;;  %v1990_v50 = vcombine.high %v3678_v11, %v3678_v11 }
  0x1c   : > { %s345_s26 = scalar_select %p344_p13, %s3658_s14, 71  ;;  %vm1043_vm2 = vcmp.lt.s32.totalorder %v3661_v5, 7  ;;  %vm1140_vm3 = vcmp.lt.s32.totalorder %v3661_v5, 6 }
  0x1d   : > { %v3672_v10 = vsub.s32 %v584_v6, %v3661_v5  ;;  %s3351_s21 = smul.u32 72, %s3665_s15  ;;  %p360_p0 = scmp.lt.s32.totalorder %s3192_s16, 71 }
  0x1e   : > { %s334_s15 = sand.u32 1, %s3520_s19   ;;  %s3454_s12 = sshll.u32 %s3548_s10, 4  ;;  %s3455_s12 = int_to_ptr.vmem [resolvable:$false] %s3454_s12 }
  0x1f   : > { %v588_v12 = vrot.slane %v579_v7, %v3672_v10  ;;  %s347_s8 = sadd.s32 %s3351_s21, %s345_s26  ;;  %v1270_v13 = vrot.slane %v1256_v8, %v3672_v10  ;;  %v595_v16 = vrot.slane %v581_v9, %v3672_v10  ;;  %v1997_v17 = vrot.slane %v3678_v11, %v3672_v10  ;;  %s5116_s16 = smov (!%p360_p0, %s3192_s16), 71 }
  0x20   : > { %s3051_s9 = sshll.u32 %s347_s8, 2  ;;  %v3711_v25 = vrot.slane %v3108_v4, %v3672_v10  ;;  %s363_s17 = sadd.s32 %s3351_s21, %s5116_s16  ;;  %v2004_v53 = vrot.slane %v1990_v50, %v3672_v10 }
  0x21   : > { %v596_v14 = vcombine.high %v588_v12, %v588_v12  ;;  %v647_v15 = vsel %vm645_vm0, %v588_v12, 0  ;;  %s3688_s13 = scalar_lea.vmem %s5063_s0, %s3051_s9  ;;  %v3698_v20 = vsel %vm645_vm0, %v1997_v17, 0  ;;  %v1327_v28 = vsel %vm645_vm0, %v1270_v13, 0  ;;  %s3054_s26 = sshll.u32 %s363_s17, 2 }
  0x22   : > { %v3429_v18 = vld [vmem:[%s3688_s13] sm:$0xff]   ;;  %v3431_v21 = vld [vmem:[%s3688_s13 + $0x8] sm:$0xff]   ;;  %v3433_v23 = vld [vmem:[%s3688_s13 + $0x10] sm:$0xff]   ;;  %v653_v31 = vsel %vm645_vm0, %v595_v16, 0  ;;  %v1271_v32 = vcombine.high %v3711_v25, %v3711_v25  ;;  %v2005_v35 = vcombine.high %v1997_v17, %v1997_v17  ;;  %s3765_s8 = scalar_lea.vmem %s5064_s1, %s3054_s26  ;;  %v1321_v52 = vsel %vm645_vm0, %v3711_v25, 0  ;;  %s3180_s17 = sshll.u32 %s3532_s22, 6 }
  0x23   : > { %3075 = vmatprep.subr.msk.bf16.mxu0 %vm645_vm0, %v596_v14  ;;  %3346 = vmatprep.subr.msk.bf16.mxu1 %vm645_vm0, %v596_v14  ;;  %v3430_v19 = vld [vmem:[%s3688_s13 + $0x60] sm:$0xff]   ;;  %511 = vst.msk [vmem:[#allocation2] sm:$0xff] %vm510_vm1, %v3429_v18  ;;  %v3432_v22 = vld [vmem:[%s3688_s13 + $0x68] sm:$0xff]   ;;  %512 = vst.msk [vmem:[#allocation2 + $0x8] sm:$0xff] %vm510_vm1, %v3431_v21  ;;  %v2061_v61 = vsel %vm645_vm0, %v2004_v53, 0  ;;  %s2893_s26 = sadd.s32 %s3180_s17, %s3658_s14  ;;  %s5011_s21 = scalar_lea.sflag [#allocation5], %s334_s15 }
  0x24   : > { %656 = vmatpush1.bf16.msra.mxu0 %v647_v15  ;;  %3347 = vmatpush1.bf16.msra.mxu1 %v647_v15  ;;  %523 = vst.msk [vmem:[#allocation2 + $0x60] sm:$0xff] %vm510_vm1, %v3430_v19  ;;  %524 = vst.msk [vmem:[#allocation2 + $0x68] sm:$0xff] %vm510_vm1, %v3432_v22  ;;  %v3434_v24 = vld [vmem:[%s3688_s13 + $0x70] sm:$0xff]   ;;  %v3435_v26 = vld [vmem:[%s3688_s13 + $0x18] sm:$0xff]   ;;  %s3181_s22 = sshll.u32 %s2893_s26, 7 }
  0x25   : > { %3349 = vmatprep.subr.msk.bf16.mxu0 %vm645_vm0, %v1270_v13  ;;  %3348 = vmatprep.subr.msk.bf16.mxu1 %vm645_vm0, %v595_v16  ;;  %513 = vst.msk [vmem:[#allocation2 + $0x10] sm:$0xff] %vm510_vm1, %v3433_v23  ;;  %525 = vst.msk [vmem:[#allocation2 + $0x70] sm:$0xff] %vm510_vm1, %v3434_v24  ;;  %v3436_v27 = vld [vmem:[%s3688_s13 + $0x78] sm:$0xff]   ;;  %v3437_v29 = vld [vmem:[%s3688_s13 + $0x20] sm:$0xff]  }
  0x26   : > { %514 = vst.msk [vmem:[#allocation2 + $0x18] sm:$0xff] %vm510_vm1, %v3435_v26  ;;  %526 = vst.msk [vmem:[#allocation2 + $0x78] sm:$0xff] %vm510_vm1, %v3436_v27  ;;  %v3438_v34 = vld [vmem:[%s3688_s13 + $0x28] sm:$0xff]   ;;  %v3439_v36 = vld [vmem:[%s3688_s13 + $0x30] sm:$0xff]  }
  0x27   : > { %515 = vst.msk [vmem:[#allocation2 + $0x20] sm:$0xff] %vm510_vm1, %v3437_v29  ;;  %516 = vst.msk [vmem:[#allocation2 + $0x28] sm:$0xff] %vm510_vm1, %v3438_v34  ;;  %v3440_v37 = vld [vmem:[%s3688_s13 + $0x38] sm:$0xff]   ;;  %v3441_v38 = vld [vmem:[%s3688_s13 + $0x40] sm:$0xff]  }
  0x28   : > { %517 = vst.msk [vmem:[#allocation2 + $0x30] sm:$0xff] %vm510_vm1, %v3439_v36  ;;  %518 = vst.msk [vmem:[#allocation2 + $0x38] sm:$0xff] %vm510_vm1, %v3440_v37  ;;  %v3442_v41 = vld [vmem:[%s3688_s13 + $0x48] sm:$0xff]   ;;  %v3443_v42 = vld [vmem:[%s3688_s13 + $0x50] sm:$0xff]  }
  0x29   : > { %519 = vst.msk [vmem:[#allocation2 + $0x40] sm:$0xff] %vm510_vm1, %v3441_v38  ;;  %520 = vst.msk [vmem:[#allocation2 + $0x48] sm:$0xff] %vm510_vm1, %v3442_v41  ;;  %v3444_v43 = vld [vmem:[%s3688_s13 + $0x58] sm:$0xff]   ;;  %v3446_v46 = vld [vmem:[%s3765_s8] sm:$0xff]   ;;  %s3049_s13 = sshll.u32 %s334_s15, 8 }
  0x2a   : > { %v563_v30 = vld [vmem:[#allocation2] sm:$0xff]  ;;  %v564_v39 = vld [vmem:[#allocation2 + $0x8] sm:$0xff]  ;;  %521 = vst.msk [vmem:[#allocation2 + $0x50] sm:$0xff] %vm510_vm1, %v3443_v42  ;;  %522 = vst.msk [vmem:[#allocation2 + $0x58] sm:$0xff] %vm510_vm1, %v3444_v43  ;;  %s4721_s16 = scalar_lea.vmem [#allocation4], %s3049_s13  ;;  %s3456_s13 = scalar_lea.vmem %s3455_s12, 8192 }
  0x2b   : > { %3076 = vmatmul.mubr.msk.bf16.vlgmr.msra.gmra.mrb[0].mxu0 %vm510_vm1, %v563_v30  ;;  %v3725_v33 = vld [vmem:[#allocation2 + $0x60] sm:$0xff]  ;;  %v3741_v40 = vld [vmem:[#allocation2 + $0x68] sm:$0xff]  ;;  %559 = vst.msk [vmem:[#allocation2 + $0x80] sm:$0xff] %vm510_vm1, %v3446_v46  ;;  %v3448_v62 = vld [vmem:[%s3765_s8 + $0x10] sm:$0xff]   ;;  %s2896_s14 = sshll.u32 %s4721_s16, 4  ;;  %s5003_s14 = int_to_ptr.vmem [resolvable:$true] %s2896_s14 }
  0x2c   : > { %3088 = vmatmul.mubr.msk.bf16.vlgmr.msra.gmra.mrb[0].mxu1 %vm510_vm1, %v3725_v33  ;;  %3279 = vmatpush3.bf16.msra.mxu0 %v1327_v28  ;;  %v3758_v44 = vld [vmem:[#allocation2 + $0x10] sm:$0xff]  ;;  %v3447_v47 = vld [vmem:[%s3765_s8 + $0x8] sm:$0xff]   ;;  %561 = vst.msk [vmem:[#allocation2 + $0x90] sm:$0xff] %vm510_vm1, %v3448_v62  ;;  %v3449_v0 = vld [vmem:[%s3765_s8 + $0x18] sm:$0xff]   ;;  %s5000_s8 = scalar_lea.hbm %s5068_s5, %s3181_s22  ;;  %s3450_s9 = scalar_lea.vmem %s5003_s14, 4096 }
  0x2d   : > { %3245 = vmatpush3.bf16.msra.mxu1 %v653_v31  ;;  %697 = vmatprep.mubr.bf16.mxu0 %v3547_v3  ;;  %v3760_v45 = vld [vmem:[#allocation2 + $0x70] sm:$0xff]  ;;  %560 = vst.msk [vmem:[#allocation2 + $0x88] sm:$0xff] %vm510_vm1, %v3447_v47  ;;  %v566_v48 = vld [vmem:[#allocation2 + $0x18] sm:$0xff]  ;;  %562 = vst.msk [vmem:[#allocation2 + $0x98] sm:$0xff] %vm510_vm1, %v3449_v0  ;;  %p3451_p1 = scmp.ne.s32.totalorder %s5003_s14, %s3450_s9  ;;  %p3457_p5 = scmp.lt.s32.totalorder %s5003_s14, %s3455_s12 }
  0x2e   : > { %817 = vmatprep.mubr.bf16.mxu1 %v3547_v3  ;;  %3109 = vmatprep.subr.msk.bf16.mxu1 %vm645_vm0, %v1271_v32  ;;  %v3777_v49 = vld [vmem:[#allocation2 + $0x78] sm:$0xff]  ;;  %v3786_v51 = vld [vmem:[#allocation2 + $0x20] sm:$0xff]  ;;  %v3798_v54 = vld [vmem:[#allocation2 + $0x28] sm:$0xff]  ;;  %p3458_p6 = scmp.lt.s32.totalorder %s3456_s13, %s3450_s9 }
  0x2f   : > { %3143 = vmatprep.subr.msk.bf16.mxu0 %vm645_vm0, %v2005_v35  ;;  %v3806_v55 = vld [vmem:[#allocation2 + $0x30] sm:$0xff]  ;;  %v3815_v56 = vld [vmem:[#allocation2 + $0x38] sm:$0xff]  ;;  %p3452_p2 = pnand %p3451_p1, %p3632_p3 }
  0x30   : > { %v3817_v57 = vld [vmem:[#allocation2 + $0x40] sm:$0xff]  ;;  %v3826_v58 = vld [vmem:[#allocation2 + $0x48] sm:$0xff]  ;;  %p3459_p7 = por %p3458_p6, %p3457_p5 }
  0x31   : > { %v3828_v59 = vld [vmem:[#allocation2 + $0x50] sm:$0xff]  ;;  %v3837_v60 = vld [vmem:[#allocation2 + $0x58] sm:$0xff]  ;;  %p3453_p4 = pneg %p3452_p2 }
  0x32   : > { %v3904_v63 = vld [vmem:[#allocation2 + $0x80] sm:$0xff] }
  0x33   : > { %3077 = vmatmul.mubr.msk.bf16.gmra.mrb[4].mxu0 %vm510_vm1, %v564_v39  ;;  %p3460_p9 = pnand %p3459_p7, %p3453_p4 }
  0x34   : > { %3089 = vmatmul.mubr.msk.bf16.gmra.mrb[4].mxu1 %vm510_vm1, %v3741_v40  ;;  %707 = vmatprep.mubr.bf16.mxu0 %v3547_v3  ;;  %v3915_v1 = vld [vmem:[#allocation2 + $0x88] sm:$0xff] }
  0x35   : > { %827 = vmatprep.mubr.bf16.mxu1 %v3547_v3 }
  0x3b   : > { %3078 = vmatmul.mubr.msk.bf16.gmra.mrb[8].mxu0 %vm510_vm1, %v3758_v44 }
  0x3c   : > { %3090 = vmatmul.mubr.msk.bf16.gmra.mrb[8].mxu1 %vm510_vm1, %v3760_v45  ;;  %717 = vmatprep.mubr.bf16.mxu0 %v3547_v3 }
  0x3d   : > { %837 = vmatprep.mubr.bf16.mxu1 %v3547_v3 }
  0x43   : > { %3079 = vmatmul.mubr.msk.bf16.gmra.mrb[12].mxu0 %vm510_vm1, %v566_v48 }
  0x44   : > { %3091 = vmatmul.mubr.msk.bf16.gmra.mrb[12].mxu1 %vm510_vm1, %v3777_v49  ;;  %727 = vmatprep.mubr.bf16.mxu0 %v3547_v3 }
  0x45   : > { %3246 = vmatprep.mubr.msk.bf16.mxu1 %vm510_vm1, %v563_v30 }
  0x4b   : > { %3080 = vmatmul.mubr.msk.bf16.gmra.mrb[16].mxu0 %vm510_vm1, %v3786_v51 }
  0x4c   : > { %3247 = vmatmul.mubr.msk.bf16.vlgmr.msra.gmra.mrb[16].mxu1 %vm510_vm1, %v564_v39  ;;  %737 = vmatprep.mubr.bf16.mxu0 %v3547_v3 }
  0x4d   : > { %1330 = vmatpush1.bf16.msra.mxu1 %v1321_v52  ;;  %3250 = vmatprep.mubr.msk.bf16.mxu1 %vm510_vm1, %v3758_v44 }
  0x4e   : > { %3350 = vmatprep.subr.msk.bf16.mxu1 %vm645_vm0, %v2004_v53 }
  0x53   : > { %3081 = vmatmul.mubr.msk.bf16.gmra.mrb[20].mxu0 %vm510_vm1, %v3798_v54 }
  0x54   : > { %3251 = vmatmul.mubr.msk.bf16.gmra.mrb[20].mxu1 %vm510_vm1, %v566_v48  ;;  %747 = vmatprep.mubr.bf16.mxu0 %v3547_v3 }
  0x55   : > { %3254 = vmatprep.mubr.msk.bf16.mxu1 %vm510_vm1, %v3786_v51 }
  0x5b   : > { %3082 = vmatmul.mubr.msk.bf16.gmra.mrb[24].mxu0 %vm510_vm1, %v3806_v55 }
  0x5c   : > { %3255 = vmatmul.mubr.msk.bf16.gmra.mrb[24].mxu1 %vm510_vm1, %v3798_v54  ;;  %757 = vmatprep.mubr.bf16.mxu0 %v3547_v3 }
  0x5d   : > { %3258 = vmatprep.mubr.msk.bf16.mxu1 %vm510_vm1, %v3806_v55 }
  0x63   : > { %3083 = vmatmul.mubr.msk.bf16.gmra.mrb[28].mxu0 %vm510_vm1, %v3815_v56 }
  0x64   : > { %3259 = vmatmul.mubr.msk.bf16.gmra.mrb[28].mxu1 %vm510_vm1, %v3815_v56  ;;  %767 = vmatprep.mubr.bf16.mxu0 %v3547_v3 }
  0x65   : > { %3262 = vmatprep.mubr.msk.bf16.mxu1 %vm510_vm1, %v3817_v57 }
  0x6b   : > { %3084 = vmatmul.mubr.msk.bf16.gmra.mrb[32].mxu0 %vm510_vm1, %v3817_v57 }
  0x6c   : > { %3263 = vmatmul.mubr.msk.bf16.gmra.mrb[32].mxu1 %vm510_vm1, %v3826_v58  ;;  %777 = vmatprep.mubr.bf16.mxu0 %v3547_v3 }
  0x6d   : > { %3266 = vmatprep.mubr.msk.bf16.mxu1 %vm510_vm1, %v3828_v59 }
  0x73   : > { %3085 = vmatmul.mubr.msk.bf16.gmra.mrb[36].mxu0 %vm510_vm1, %v3826_v58 }
  0x74   : > { %3267 = vmatmul.mubr.msk.bf16.gmra.mrb[36].mxu1 %vm510_vm1, %v3837_v60  ;;  %787 = vmatprep.mubr.bf16.mxu0 %v3547_v3 }
  0x75   : > { %3270 = vmatprep.mubr.msk.bf16.mxu1 %vm510_vm1, %v3725_v33 }
  0x7b   : > { %3086 = vmatmul.mubr.msk.bf16.gmra.mrb[40].mxu0 %vm510_vm1, %v3828_v59 }
  0x7c   : > { %3271 = vmatmul.mubr.msk.bf16.gmra.mrb[40].mxu1 %vm510_vm1, %v3741_v40  ;;  %797 = vmatprep.mubr.bf16.mxu0 %v3547_v3 }
  0x7d   : > { %3274 = vmatprep.mubr.msk.bf16.mxu1 %vm510_vm1, %v3760_v45 }
  0x83   : > { %3087 = vmatmul.mubr.msk.bf16.gmra.mrb[44].mxu0 %vm510_vm1, %v3837_v60 }
  0x84   : > { %3275 = vmatmul.mubr.msk.bf16.gmra.mrb[44].mxu1 %vm510_vm1, %v3777_v49  ;;  %3280 = vmatprep.mubr.msk.bf16.mxu0 %vm510_vm1, %v3758_v44 }
  0x85   : > { %1361 = vmatprep.mubr.bf16.mxu1 %v3547_v3 }
  0x8b   : > { %3281 = vmatmul.mubr.msk.bf16.vlgmr.msra.gmra.mrb[48].mxu0 %vm510_vm1, %v566_v48 }
  0x8c   : > { %3110 = vmatmul.mubr.msk.bf16.vlgmr.msra.gmra.mrb[48].mxu1 %vm510_vm1, %v3758_v44  ;;  %2064 = vmatpush1.bf16.msra.mxu0 %v3698_v20 }
  0x8d   : > { %3313 = vmatpush3.bf16.msra.mxu1 %v2061_v61  ;;  %1371 = vmatprep.mubr.bf16.mxu1 %v3547_v3 }
  0x8e   : > { %3284 = vmatprep.mubr.msk.bf16.mxu0 %vm510_vm1, %v3786_v51 }
  0x93   : > { %3285 = vmatmul.mubr.msk.bf16.gmra.mrb[52].mxu0 %vm510_vm1, %v3798_v54 }
  0x94   : > { %3111 = vmatmul.mubr.msk.bf16.gmra.mrb[52].mxu1 %vm510_vm1, %v566_v48  ;;  %3288 = vmatprep.mubr.msk.bf16.mxu0 %vm510_vm1, %v3806_v55 }
  0x95   : > { %1381 = vmatprep.mubr.bf16.mxu1 %v3547_v3 }
  0x9b   : > { %3289 = vmatmul.mubr.msk.bf16.gmra.mrb[56].mxu0 %vm510_vm1, %v3815_v56 }
  0x9c   : > { %3112 = vmatmul.mubr.msk.bf16.gmra.mrb[56].mxu1 %vm510_vm1, %v3786_v51  ;;  %3292 = vmatprep.mubr.msk.bf16.mxu0 %vm510_vm1, %v3817_v57 }
  0x9d   : > { %1391 = vmatprep.mubr.bf16.mxu1 %v3547_v3 }
  0xa3   : > { %3293 = vmatmul.mubr.msk.bf16.gmra.mrb[60].mxu0 %vm510_vm1, %v3826_v58 }
  0xa4   : > { %3113 = vmatmul.mubr.msk.bf16.gmra.mrb[60].mxu1 %vm510_vm1, %v3798_v54  ;;  %3296 = vmatprep.mubr.msk.bf16.mxu0 %vm510_vm1, %v3828_v59 }
  0xa5   : > { %1401 = vmatprep.mubr.bf16.mxu1 %v3547_v3 }
  0xab   : > { %3297 = vmatmul.mubr.msk.bf16.gmra.mrb[64].mxu0 %vm510_vm1, %v3837_v60 }
  0xac   : > { %3114 = vmatmul.mubr.msk.bf16.gmra.mrb[64].mxu1 %vm510_vm1, %v3806_v55  ;;  %3300 = vmatprep.mubr.msk.bf16.mxu0 %vm510_vm1, %v3725_v33 }
  0xad   : > { %1411 = vmatprep.mubr.bf16.mxu1 %v3547_v3 }
  0xb3   : > { %3301 = vmatmul.mubr.msk.bf16.gmra.mrb[68].mxu0 %vm510_vm1, %v3741_v40 }
  0xb4   : > { %3115 = vmatmul.mubr.msk.bf16.gmra.mrb[68].mxu1 %vm510_vm1, %v3815_v56  ;;  %3304 = vmatprep.mubr.msk.bf16.mxu0 %vm510_vm1, %v3760_v45 }
  0xb5   : > { %1421 = vmatprep.mubr.bf16.mxu1 %v3547_v3 }
  0xbb   : > { %3305 = vmatmul.mubr.msk.bf16.gmra.mrb[72].mxu0 %vm510_vm1, %v3777_v49 }
  0xbc   : > { %3116 = vmatmul.mubr.msk.bf16.gmra.mrb[72].mxu1 %vm510_vm1, %v3817_v57  ;;  %3308 = vmatprep.mubr.msk.bf16.mxu0 %vm510_vm1, %v3904_v63 }
  0xbd   : > { %1431 = vmatprep.mubr.bf16.mxu1 %v3547_v3 }
  0xc3   : > { %3309 = vmatmul.mubr.msk.bf16.gmra.mrb[76].mxu0 %vm510_vm1, %v3915_v1 }
  0xc4   : > { %3117 = vmatmul.mubr.msk.bf16.gmra.mrb[76].mxu1 %vm510_vm1, %v3826_v58  ;;  %2095 = vmatprep.mubr.bf16.mxu0 %v3547_v3 }
  0xc5   : > { %1441 = vmatprep.mubr.bf16.mxu1 %v3547_v3 }
  0xcb   : > { %3144 = vmatmul.mubr.msk.bf16.vlgmr.msra.gmra.mrb[80].mxu0 %vm510_vm1, %v3786_v51 }
  0xcc   : > { %3118 = vmatmul.mubr.msk.bf16.gmra.mrb[80].mxu1 %vm510_vm1, %v3828_v59  ;;  %2105 = vmatprep.mubr.bf16.mxu0 %v3547_v3 }
  0xcd   : > { %1451 = vmatprep.mubr.bf16.mxu1 %v3547_v3 }
  0xd3   : > { %3145 = vmatmul.mubr.msk.bf16.gmra.mrb[84].mxu0 %vm510_vm1, %v3798_v54 }
  0xd4   : > { %3119 = vmatmul.mubr.msk.bf16.gmra.mrb[84].mxu1 %vm510_vm1, %v3837_v60  ;;  %2115 = vmatprep.mubr.bf16.mxu0 %v3547_v3 }
  0xd5   : > { %1461 = vmatprep.mubr.bf16.mxu1 %v3547_v3 }
  0xdb   : > { %3146 = vmatmul.mubr.msk.bf16.gmra.mrb[88].mxu0 %vm510_vm1, %v3806_v55 }
  0xdc   : > { %3120 = vmatmul.mubr.msk.bf16.gmra.mrb[88].mxu1 %vm510_vm1, %v3725_v33  ;;  %2125 = vmatprep.mubr.bf16.mxu0 %v3547_v3 }
  0xdd   : > { %1471 = vmatprep.mubr.bf16.mxu1 %v3547_v3 }
  0xe3   : > { %3147 = vmatmul.mubr.msk.bf16.gmra.mrb[92].mxu0 %vm510_vm1, %v3815_v56 }
  0xe4   : > { %3121 = vmatmul.mubr.msk.bf16.gmra.mrb[92].mxu1 %vm510_vm1, %v3741_v40  ;;  %2135 = vmatprep.mubr.bf16.mxu0 %v3547_v3 }
  0xe5   : > { %1481 = vmatprep.mubr.bf16.mxu1 %v3547_v3 }
  0xeb   : > { %3148 = vmatmul.mubr.msk.bf16.gmra.mrb[96].mxu0 %vm510_vm1, %v3817_v57 }
  0xec   : > { %3122 = vmatmul.mubr.msk.bf16.gmra.mrb[96].mxu1 %vm510_vm1, %v3760_v45  ;;  %2145 = vmatprep.mubr.bf16.mxu0 %v3547_v3 }
  0xed   : > { %1491 = vmatprep.mubr.bf16.mxu1 %v3547_v3 }
  0xf3   : > { %3149 = vmatmul.mubr.msk.bf16.gmra.mrb[100].mxu0 %vm510_vm1, %v3826_v58 }
  0xf4   : > { %3123 = vmatmul.mubr.msk.bf16.gmra.mrb[100].mxu1 %vm510_vm1, %v3777_v49  ;;  %2155 = vmatprep.mubr.bf16.mxu0 %v3547_v3 }
  0xf5   : > { %1501 = vmatprep.mubr.bf16.mxu1 %v3547_v3 }
  0xfb   : > { %3150 = vmatmul.mubr.msk.bf16.gmra.mrb[104].mxu0 %vm510_vm1, %v3828_v59 }
  0xfc   : > { %3124 = vmatmul.mubr.msk.bf16.gmra.mrb[104].mxu1 %vm510_vm1, %v3904_v63  ;;  %2165 = vmatprep.mubr.bf16.mxu0 %v3547_v3 }
  0xfd   : > { %1511 = vmatprep.mubr.bf16.mxu1 %v3547_v3 }
  0xfe   : > { %v689_v2 = vpop.f32.mrb[0].mxu0 }
  0xff   : > { %v809_v4 = vpop.f32.mrb[0].mxu1  ;;  %v3965_v6 = vpop.f32.mrb[1].mxu0 }
 0x100   : > { %v3967_v7 = vpop.f32.mrb[1].mxu1  ;;  %v693_v8 = vpop.f32.mrb[2].mxu0  ;;  %v1009_v12 = vrot.slane %v3965_v6, 1 }
 0x101   : > { %v1033_v9 = vrot.slane %v3967_v7, 1  ;;  %v813_v10 = vpop.f32.mrb[2].mxu1  ;;  %v695_v11 = vpop.f32.mrb[3].mxu0 }
 0x102   : > { %v1010_v13 = vrot.slane %v695_v11, 1  ;;  %v815_v14 = vpop.f32.mrb[3].mxu1 }
 0x103   : > { %v1034_v15 = vrot.slane %v815_v14, 1  ;;  %3151 = vmatmul.mubr.msk.bf16.gmra.mrb[108].mxu0 %vm510_vm1, %v3837_v60 }
 0x104   : > { %v1074_v16 = vsel %vm1043_vm2, %v1009_v12, %v1010_v13  ;;  %3125 = vmatmul.mubr.msk.bf16.gmra.mrb[108].mxu1 %vm510_vm1, %v3915_v1  ;;  %2175 = vmatprep.mubr.bf16.mxu0 %v3547_v3 }
 0x105   : > { %v3981_v17 = vadd.f32 %v1074_v16, %v689_v2  ;;  %v1050_v18 = vsel %vm1043_vm2, %v1033_v9, %v1034_v15  ;;  %3314 = vmatprep.mubr.msk.bf16.mxu1 %vm510_vm1, %v3786_v51 }
 0x106   : > { %v3989_v19 = vadd.f32 %v1050_v18, %v809_v4  ;;  %v699_v20 = vpop.f32.mrb[4].mxu0 }
 0x107   : > { %v819_v21 = vpop.f32.mrb[4].mxu1  ;;  %v701_v22 = vpop.f32.mrb[5].mxu0 }
 0x108   : > { %v1011_v23 = vrot.slane %v701_v22, 1  ;;  %v821_v24 = vpop.f32.mrb[5].mxu1  ;;  %v703_v25 = vpop.f32.mrb[6].mxu0 }
 0x109   : > { %v1035_v26 = vrot.slane %v821_v24, 1  ;;  %v823_v27 = vpop.f32.mrb[6].mxu1  ;;  %v705_v28 = vpop.f32.mrb[7].mxu0 }
 0x10a   : > { %v1073_v29 = vsel %vm1043_vm2, %v1010_v13, %v1011_v23  ;;  %v1012_v30 = vrot.slane %v705_v28, 1  ;;  %v825_v31 = vpop.f32.mrb[7].mxu1 }
 0x10b   : > { %v3993_v32 = vadd.f32 %v1073_v29, %v693_v8  ;;  %v1049_v34 = vsel %vm1043_vm2, %v1034_v15, %v1035_v26  ;;  %v1036_v35 = vrot.slane %v825_v31, 1  ;;  %3152 = vmatmul.mubr.msk.bf16.gmra.mrb[112].mxu0 %vm510_vm1, %v3725_v33 }
 0x10c   : > { %v3999_v36 = vadd.f32 %v1049_v34, %v813_v10  ;;  %v1072_v37 = vsel %vm1043_vm2, %v1011_v23, %v1012_v30  ;;  %3315 = vmatmul.mubr.msk.bf16.vlgmr.msra.gmra.mrb[112].mxu1 %vm510_vm1, %v3798_v54  ;;  %2185 = vmatprep.mubr.bf16.mxu0 %v3547_v3 }
 0x10d   : > { %v4006_v38 = vadd.f32 %v1072_v37, %v699_v20  ;;  %v1048_v39 = vsel %vm1043_vm2, %v1035_v26, %v1036_v35  ;;  %3318 = vmatprep.mubr.msk.bf16.mxu1 %vm510_vm1, %v3806_v55 }
 0x10e   : > { %v4012_v41 = vadd.f32 %v1048_v39, %v819_v21  ;;  %v709_v42 = vpop.f32.mrb[8].mxu0 }
 0x10f   : > { %v829_v43 = vpop.f32.mrb[8].mxu1  ;;  %v711_v44 = vpop.f32.mrb[9].mxu0 }
 0x110   : > { %v1013_v46 = vrot.slane %v711_v44, 1  ;;  %v831_v47 = vpop.f32.mrb[9].mxu1  ;;  %v713_v48 = vpop.f32.mrb[10].mxu0 }
 0x111   : > { %v1037_v50 = vrot.slane %v831_v47, 1  ;;  %v833_v51 = vpop.f32.mrb[10].mxu1  ;;  %v715_v52 = vpop.f32.mrb[11].mxu0 }
 0x112   : > { %v1071_v53 = vsel %vm1043_vm2, %v1012_v30, %v1013_v46  ;;  %v1014_v54 = vrot.slane %v715_v52, 1  ;;  %v835_v61 = vpop.f32.mrb[11].mxu1 }
 0x113   : > { %v4016_v62 = vadd.f32 %v1071_v53, %v703_v25  ;;  %v1047_v55 = vsel %vm1043_vm2, %v1036_v35, %v1037_v50  ;;  %v1038_v0 = vrot.slane %v835_v61, 1  ;;  %3153 = vmatmul.mubr.msk.bf16.gmra.mrb[116].mxu0 %vm510_vm1, %v3741_v40 }
 0x114   : > { %v4022_v2 = vadd.f32 %v1047_v55, %v823_v27  ;;  %v1070_v4 = vsel %vm1043_vm2, %v1013_v46, %v1014_v54  ;;  %3319 = vmatmul.mubr.msk.bf16.gmra.mrb[116].mxu1 %vm510_vm1, %v3815_v56  ;;  %2195 = vmatprep.mubr.bf16.mxu0 %v3547_v3 }
 0x115   : > { %v4029_v8 = vadd.f32 %v1070_v4, %v709_v42  ;;  %v1046_v10 = vsel %vm1043_vm2, %v1037_v50, %v1038_v0  ;;  %3322 = vmatprep.mubr.msk.bf16.mxu1 %vm510_vm1, %v3817_v57 }
 0x116   : > { %v4035_v11 = vadd.f32 %v1046_v10, %v829_v43  ;;  %v719_v13 = vpop.f32.mrb[12].mxu0 }
 0x117   : > { %v839_v14 = vpop.f32.mrb[12].mxu1  ;;  %v721_v15 = vpop.f32.mrb[13].mxu0 }
 0x118   : > { %v1015_v16 = vrot.slane %v721_v15, 1  ;;  %v841_v18 = vpop.f32.mrb[13].mxu1  ;;  %v723_v20 = vpop.f32.mrb[14].mxu0 }
 0x119   : > { %v1039_v21 = vrot.slane %v841_v18, 1  ;;  %v843_v56 = vpop.f32.mrb[14].mxu1  ;;  %v725_v22 = vpop.f32.mrb[15].mxu0 }
 0x11a   : > { %v1069_v23 = vsel %vm1043_vm2, %v1014_v54, %v1015_v16  ;;  %v1016_v24 = vrot.slane %v725_v22, 1  ;;  %v845_v25 = vpop.f32.mrb[15].mxu1 }
 0x11b   : > { %v4039_v26 = vadd.f32 %v1069_v23, %v713_v48  ;;  %v1045_v57 = vsel %vm1043_vm2, %v1038_v0, %v1039_v21  ;;  %v1040_v27 = vrot.slane %v845_v25, 1  ;;  %3154 = vmatmul.mubr.msk.bf16.gmra.mrb[120].mxu0 %vm510_vm1, %v3760_v45 }
 0x11c   : > { %v4045_v28 = vadd.f32 %v1045_v57, %v833_v51  ;;  %v1068_v29 = vsel %vm1043_vm2, %v1015_v16, %v1016_v24  ;;  %3323 = vmatmul.mubr.msk.bf16.gmra.mrb[120].mxu1 %vm510_vm1, %v3826_v58  ;;  %2205 = vmatprep.mubr.bf16.mxu0 %v3547_v3 }
 0x11d   : > { %v1082_v30 = vadd.f32 %v1068_v29, %v719_v13  ;;  %v1044_v31 = vsel %vm1043_vm2, %v1039_v21, %v1040_v27  ;;  %v1075_v34 = vsel %vm1043_vm2, %v1040_v27, %v1009_v12  ;;  %3326 = vmatprep.mubr.msk.bf16.mxu1 %vm510_vm1, %v3828_v59 }
 0x11e   : > { %v4060_v35 = vadd.f32 %v1044_v31, %v839_v14  ;;  %v4062_v37 = vadd.f32 %v1075_v34, %v843_v56  ;;  %v729_v39 = vpop.f32.mrb[16].mxu0 }
 0x11f   : > { %v3248_v58 = vpop.f32.mrb[16].mxu1  ;;  %v731_v42 = vpop.f32.mrb[17].mxu0 }
 0x120   : > { %v1110_v43 = vrot.slane %v3248_v58, 2  ;;  %v1017_v44 = vrot.slane %v731_v42, 1  ;;  %v4064_v46 = vpop.f32.mrb[17].mxu1  ;;  %v733_v47 = vpop.f32.mrb[18].mxu0 }
 0x121   : > { %v1108_v6 = vrot.slane %v4064_v46, 2  ;;  %v3249_v12 = vpop.f32.mrb[18].mxu1  ;;  %v735_v48 = vpop.f32.mrb[19].mxu0 }
 0x122   : > { %v1067_v59 = vsel %vm1043_vm2, %v1016_v24, %v1017_v44  ;;  %v1111_v50 = vrot.slane %v3249_v12, 2  ;;  %v1018_v51 = vrot.slane %v735_v48, 1  ;;  %v885_v52 = vpop.f32.mrb[19].mxu1 }
 0x123   : > { %v1083_v53 = vadd.f32 %v1067_v59, %v723_v20  ;;  %v1109_v54 = vrot.slane %v885_v52, 2  ;;  %3155 = vmatmul.mubr.msk.bf16.gmra.mrb[124].mxu0 %vm510_vm1, %v3777_v49 }
 0x124   : > { %v1169_v61 = vsel %vm1140_vm3, %v1110_v43, %v1111_v50  ;;  %v1066_v55 = vsel %vm1043_vm2, %v1017_v44, %v1018_v51  ;;  %3327 = vmatmul.mubr.msk.bf16.gmra.mrb[124].mxu1 %vm510_vm1, %v3837_v60  ;;  %2215 = vmatprep.mubr.bf16.mxu0 %v3547_v3 }
 0x125   : > { %v4080_v0 = vadd.f32 %v1169_v61, %v4006_v38  ;;  %v4082_v4 = vadd.f32 %v1066_v55, %v729_v39  ;;  %v1170_v10 = vsel %vm1140_vm3, %v1109_v54, %v1110_v43  ;;  %v1171_v13 = vsel %vm1140_vm3, %v1108_v6, %v1109_v54  ;;  %3330 = vmatprep.mubr.msk.bf16.mxu1 %vm510_vm1, %v3725_v33 }
 0x126   : > { %v4093_v60 = vadd.f32 %v1171_v13, %v3981_v17  ;;  %v4096_v14 = vadd.f32 %v1170_v10, %v3993_v32  ;;  %v739_v38 = vpop.f32.mrb[20].mxu0 }
 0x127   : > { %v3252_v15 = vpop.f32.mrb[20].mxu1  ;;  %v741_v16 = vpop.f32.mrb[21].mxu0 }
 0x128   : > { %v1114_v18 = vrot.slane %v3252_v15, 2  ;;  %v1019_v20 = vrot.slane %v741_v16, 1  ;;  %v898_v21 = vpop.f32.mrb[21].mxu1  ;;  %v743_v56 = vpop.f32.mrb[22].mxu0 }
 0x129   : > { %v1112_v22 = vrot.slane %v898_v21, 2  ;;  %v3253_v23 = vpop.f32.mrb[22].mxu1  ;;  %v745_v24 = vpop.f32.mrb[23].mxu0 }
 0x12a   : > { %v1065_v25 = vsel %vm1043_vm2, %v1018_v51, %v1019_v20  ;;  %v1115_v33 = vrot.slane %v3253_v23, 2  ;;  %v1020_v57 = vrot.slane %v745_v24, 1  ;;  %v901_v17 = vpop.f32.mrb[23].mxu1 }
 0x12b   : > { %v1085_v27 = vadd.f32 %v1065_v25, %v733_v47  ;;  %v1168_v32 = vsel %vm1140_vm3, %v1111_v50, %v1112_v22  ;;  %v1113_v29 = vrot.slane %v901_v17, 2  ;;  %3156 = vmatmul.mubr.msk.bf16.gmra.mrb[128].mxu0 %vm510_vm1, %v3904_v63 }
 0x12c   : > { %v4105_v31 = vadd.f32 %v1168_v32, %v4016_v62  ;;  %v1165_v34 = vsel %vm1140_vm3, %v1114_v18, %v1115_v33  ;;  %v1064_v39 = vsel %vm1043_vm2, %v1019_v20, %v1020_v57  ;;  %3331 = vmatmul.mubr.msk.bf16.gmra.mrb[128].mxu1 %vm510_vm1, %v3741_v40  ;;  %2225 = vmatprep.mubr.bf16.mxu0 %v3547_v3 }
 0x12d   : > { %v4114_v58 = vadd.f32 %v1165_v34, %v1082_v30  ;;  %v1086_v42 = vadd.f32 %v1064_v39, %v739_v38  ;;  %v1166_v43 = vsel %vm1140_vm3, %v1113_v29, %v1114_v18  ;;  %v1167_v62 = vsel %vm1140_vm3, %v1112_v22, %v1113_v29  ;;  %3334 = vmatprep.mubr.msk.bf16.mxu1 %vm510_vm1, %v3760_v45  ;;  %v1985_v29 = vld [vmem:[#allocation2 + $0x90] sm:$0xff] }
 0x12e   : > { %v4123_v44 = vadd.f32 %v1167_v62, %v4029_v8  ;;  %v4126_v47 = vadd.f32 %v1166_v43, %v4039_v26  ;;  %v749_v40 = vpop.f32.mrb[24].mxu0 }
 0x12f   : > { %v3256_v12 = vpop.f32.mrb[24].mxu1  ;;  %v751_v30 = vpop.f32.mrb[25].mxu0 }
 0x130   : > { %v1118_v48 = vrot.slane %v3256_v12, 2  ;;  %v1021_v59 = vrot.slane %v751_v30, 1  ;;  %v914_v50 = vpop.f32.mrb[25].mxu1  ;;  %v753_v51 = vpop.f32.mrb[26].mxu0 }
 0x131   : > { %v1116_v52 = vrot.slane %v914_v50, 2  ;;  %v3257_v54 = vpop.f32.mrb[26].mxu1  ;;  %v755_v61 = vpop.f32.mrb[27].mxu0 }
 0x132   : > { %v1063_v55 = vsel %vm1043_vm2, %v1020_v57, %v1021_v59  ;;  %v1119_v45 = vrot.slane %v3257_v54, 2  ;;  %v1022_v10 = vrot.slane %v755_v61, 1  ;;  %v917_v8 = vpop.f32.mrb[27].mxu1 }
 0x133   : > { %v1087_v13 = vadd.f32 %v1063_v55, %v743_v56  ;;  %v1164_v26 = vsel %vm1140_vm3, %v1115_v33, %v1116_v52  ;;  %v1117_v38 = vrot.slane %v917_v8, 2  ;;  %3157 = vmatmul.mubr.msk.bf16.gmra.mrb[132].mxu0 %vm510_vm1, %v3915_v1 }
 0x134   : > { %v4134_v15 = vadd.f32 %v1164_v26, %v1083_v53  ;;  %v1161_v16 = vsel %vm1140_vm3, %v1118_v48, %v1119_v45  ;;  %v1062_v18 = vsel %vm1043_vm2, %v1021_v59, %v1022_v10  ;;  %3335 = vmatmul.mubr.msk.bf16.gmra.mrb[132].mxu1 %vm510_vm1, %v3777_v49  ;;  %2235 = vmatprep.mubr.bf16.mxu0 %v3547_v3 }
 0x135   : > { %v4143_v20 = vadd.f32 %v1161_v16, %v1086_v42  ;;  %v1088_v21 = vadd.f32 %v1062_v18, %v749_v40  ;;  %v1162_v56 = vsel %vm1140_vm3, %v1117_v38, %v1118_v48  ;;  %v1163_v53 = vsel %vm1140_vm3, %v1116_v52, %v1117_v38  ;;  %3338 = vmatprep.mubr.msk.bf16.mxu1 %vm510_vm1, %v3904_v63  ;;  %v1986_v38 = vld [vmem:[#allocation2 + $0x98] sm:$0xff] }
 0x136   : > { %v4152_v22 = vadd.f32 %v1163_v53, %v4082_v4  ;;  %v4154_v23 = vadd.f32 %v1162_v56, %v1085_v27  ;;  %v759_v49 = vpop.f32.mrb[28].mxu0 }
 0x137   : > { %v3260_v24 = vpop.f32.mrb[28].mxu1  ;;  %v761_v25 = vpop.f32.mrb[29].mxu0 }
 0x138   : > { %v1122_v33 = vrot.slane %v3260_v24, 2  ;;  %v1023_v57 = vrot.slane %v761_v25, 1  ;;  %v930_v17 = vpop.f32.mrb[29].mxu1  ;;  %v763_v32 = vpop.f32.mrb[30].mxu0 }
 0x139   : > { %v1120_v34 = vrot.slane %v930_v17, 2  ;;  %v3261_v39 = vpop.f32.mrb[30].mxu1  ;;  %v765_v42 = vpop.f32.mrb[31].mxu0 }
 0x13a   : > { %v1061_v43 = vsel %vm1043_vm2, %v1022_v10, %v1023_v57  ;;  %v1123_v63 = vrot.slane %v3261_v39, 2  ;;  %v1024_v62 = vrot.slane %v765_v42, 1  ;;  %v933_v4 = vpop.f32.mrb[31].mxu1 }
 0x13b   : > { %v1089_v40 = vadd.f32 %v1061_v43, %v753_v51  ;;  %v1160_v27 = vsel %vm1140_vm3, %v1119_v45, %v1120_v34  ;;  %v1121_v12 = vrot.slane %v933_v4, 2  ;;  %3158 = vmatmul.mubr.msk.bf16.gmra.mrb[136].mxu0 %vm510_vm1, %v1985_v29 }
 0x13c   : > { %v4161_v30 = vadd.f32 %v1160_v27, %v1087_v13  ;;  %v1157_v48 = vsel %vm1140_vm3, %v1122_v33, %v1123_v63  ;;  %v1060_v59 = vsel %vm1043_vm2, %v1023_v57, %v1024_v62  ;;  %3339 = vmatmul.mubr.msk.bf16.gmra.mrb[136].mxu1 %vm510_vm1, %v3915_v1  ;;  %2245 = vmatprep.mubr.bf16.mxu0 %v3547_v3 }
 0x13d   : > { %v1090_v50 = vadd.f32 %v1060_v59, %v759_v49  ;;  %v1158_v51 = vsel %vm1140_vm3, %v1121_v12, %v1122_v33  ;;  %v1159_v52 = vsel %vm1140_vm3, %v1120_v34, %v1121_v12  ;;  %3342 = vmatprep.mubr.msk.bf16.mxu1 %vm510_vm1, %v1985_v29 }
 0x13e   : > { %v4175_v54 = vadd.f32 %v1159_v52, %v1088_v21  ;;  %v4177_v61 = vadd.f32 %v1158_v51, %v1089_v40  ;;  %v769_v55 = vpop.f32.mrb[32].mxu0 }
 0x13f   : > { %v4179_v45 = vadd.f32 %v1157_v48, %v1090_v50  ;;  %v3264_v10 = vpop.f32.mrb[32].mxu1  ;;  %v771_v1 = vpop.f32.mrb[33].mxu0 }
 0x140   : > { %v1126_v8 = vrot.slane %v3264_v10, 2  ;;  %v1025_v3 = vrot.slane %v771_v1, 1  ;;  %v946_v13 = vpop.f32.mrb[33].mxu1  ;;  %v773_v26 = vpop.f32.mrb[34].mxu0 }
 0x141   : > { %v1124_v16 = vrot.slane %v946_v13, 2  ;;  %v3265_v18 = vpop.f32.mrb[34].mxu1  ;;  %v775_v56 = vpop.f32.mrb[35].mxu0 }
 0x142   : > { %v1059_v53 = vsel %vm1043_vm2, %v1024_v62, %v1025_v3  ;;  %v1127_v21 = vrot.slane %v3265_v18, 2  ;;  %v1026_v49 = vrot.slane %v775_v56, 1  ;;  %v949_v24 = vpop.f32.mrb[35].mxu1 }
 0x143   : > { %v1091_v25 = vadd.f32 %v1059_v53, %v763_v32  ;;  %v1156_v33 = vsel %vm1140_vm3, %v1123_v63, %v1124_v16  ;;  %v1125_v57 = vrot.slane %v949_v24, 2  ;;  %3159 = vmatmul.mubr.msk.bf16.gmra.mrb[140].mxu0 %vm510_vm1, %v1986_v38 }
 0x144   : > { %v1153_v17 = vsel %vm1140_vm3, %v1126_v8, %v1127_v21  ;;  %v1058_v29 = vsel %vm1043_vm2, %v1025_v3, %v1026_v49  ;;  %3343 = vmatmul.mubr.msk.bf16.gmra.mrb[140].mxu1 %vm510_vm1, %v1986_v38 }
 0x145   : > { %v4191_v34 = vadd.f32 %v1156_v33, %v1091_v25  ;;  %v1092_v39 = vadd.f32 %v1058_v29, %v769_v55  ;;  %v1154_v32 = vsel %vm1140_vm3, %v1125_v57, %v1126_v8  ;;  %v1155_v42 = vsel %vm1140_vm3, %v1124_v16, %v1125_v57 }
 0x146   : > { %v779_v43 = vpop.f32.mrb[36].mxu0 }
 0x147   : > { %v4197_v63 = vadd.f32 %v1155_v42, %v1092_v39  ;;  %v3268_v62 = vpop.f32.mrb[36].mxu1  ;;  %v781_v4 = vpop.f32.mrb[37].mxu0 }
 0x148   : > { %v1130_v40 = vrot.slane %v3268_v62, 2  ;;  %v1027_v27 = vrot.slane %v781_v4, 1  ;;  %v962_v12 = vpop.f32.mrb[37].mxu1  ;;  %v783_v48 = vpop.f32.mrb[38].mxu0 }
 0x149   : > { %v1128_v59 = vrot.slane %v962_v12, 2  ;;  %v3269_v50 = vpop.f32.mrb[38].mxu1  ;;  %v785_v51 = vpop.f32.mrb[39].mxu0 }
 0x14a   : > { %v1057_v52 = vsel %vm1043_vm2, %v1026_v49, %v1027_v27  ;;  %v1131_v55 = vrot.slane %v3269_v50, 2  ;;  %v1028_v10 = vrot.slane %v785_v51, 1  ;;  %v965_v1 = vpop.f32.mrb[39].mxu1 }
 0x14b   : > { %v1093_v8 = vadd.f32 %v1057_v52, %v773_v26  ;;  %v1152_v3 = vsel %vm1140_vm3, %v1127_v21, %v1128_v59  ;;  %v1129_v13 = vrot.slane %v965_v1, 2 }
 0x14c   : > { %v4205_v38 = vsel %vm1140_vm3, %v1130_v40, %v1131_v55  ;;  %v1056_v16 = vsel %vm1043_vm2, %v1027_v27, %v1028_v10 }
 0x14d   : > { %v4209_v18 = vadd.f32 %v1154_v32, %v1093_v8  ;;  %v1094_v56 = vadd.f32 %v1056_v16, %v779_v43  ;;  %v1150_v53 = vsel %vm1140_vm3, %v1129_v13, %v1130_v40  ;;  %v1151_v26 = vsel %vm1140_vm3, %v1128_v59, %v1129_v13 }
 0x14e   : > { %v789_v49 = vpop.f32.mrb[40].mxu0 }
 0x14f   : > { %v4215_v24 = vadd.f32 %v1153_v17, %v1094_v56  ;;  %v3272_v21 = vpop.f32.mrb[40].mxu1  ;;  %v791_v25 = vpop.f32.mrb[41].mxu0 }
 0x150   : > { %v1134_v33 = vrot.slane %v3272_v21, 2  ;;  %v1029_v57 = vrot.slane %v791_v25, 1  ;;  %v978_v29 = vpop.f32.mrb[41].mxu1  ;;  %v793_v39 = vpop.f32.mrb[42].mxu0 }
 0x151   : > { %v1132_v42 = vrot.slane %v978_v29, 2  ;;  %v3273_v62 = vpop.f32.mrb[42].mxu1  ;;  %v795_v32 = vpop.f32.mrb[43].mxu0 }
 0x152   : > { %v1055_v43 = vsel %vm1043_vm2, %v1028_v10, %v1029_v57  ;;  %v1135_v4 = vrot.slane %v3273_v62, 2  ;;  %v1030_v40 = vrot.slane %v795_v32, 1  ;;  %v981_v27 = vpop.f32.mrb[43].mxu1 }
 0x153   : > { %v1095_v12 = vadd.f32 %v1055_v43, %v783_v48  ;;  %v1148_v17 = vsel %vm1140_vm3, %v1131_v55, %v1132_v42  ;;  %v1133_v59 = vrot.slane %v981_v27, 2 }
 0x154   : > { %v1145_v50 = vsel %vm1140_vm3, %v1134_v33, %v1135_v4  ;;  %v1054_v51 = vsel %vm1043_vm2, %v1029_v57, %v1030_v40 }
 0x155   : > { %v4225_v52 = vadd.f32 %v1152_v3, %v1095_v12  ;;  %v4228_v1 = vadd.f32 %v1145_v50, %v4012_v41  ;;  %v1096_v10 = vadd.f32 %v1054_v51, %v789_v49  ;;  %v1146_v8 = vsel %vm1140_vm3, %v1133_v59, %v1134_v33 }
 0x156   : > { %v1147_v48 = vsel %vm1140_vm3, %v1132_v42, %v1133_v59  ;;  %v4235_v55 = vadd.f32 %v1146_v8, %v3999_v36  ;;  %v799_v13 = vpop.f32.mrb[44].mxu0 }
 0x157   : > { %v4237_v16 = vadd.f32 %v1151_v26, %v1096_v10  ;;  %v4240_v56 = vadd.f32 %v1147_v48, %v3989_v19  ;;  %v3276_v3 = vpop.f32.mrb[44].mxu1  ;;  %v801_v21 = vpop.f32.mrb[45].mxu0 }
 0x158   : > { %v1138_v41 = vrot.slane %v3276_v3, 2  ;;  %v1031_v25 = vrot.slane %v801_v21, 1  ;;  %v994_v49 = vpop.f32.mrb[45].mxu1  ;;  %v803_v57 = vpop.f32.mrb[46].mxu0 }
 0x159   : > { %v1136_v29 = vrot.slane %v994_v49, 2  ;;  %v3277_v33 = vpop.f32.mrb[46].mxu1  ;;  %v805_v62 = vpop.f32.mrb[47].mxu0 }
 0x15a   : > { %v1053_v42 = vsel %vm1043_vm2, %v1030_v40, %v1031_v25  ;;  %v1139_v36 = vrot.slane %v3277_v33, 2  ;;  %v1032_v32 = vrot.slane %v805_v62, 1  ;;  %v997_v43 = vpop.f32.mrb[47].mxu1 }
 0x15b   : > { %v1097_v26 = vadd.f32 %v1053_v42, %v793_v39  ;;  %v1144_v19 = vsel %vm1140_vm3, %v1135_v4, %v1136_v29  ;;  %v1137_v27 = vrot.slane %v997_v43, 2 }
 0x15c   : > { %v4247_v12 = vadd.f32 %v1144_v19, %v4022_v2  ;;  %v1141_v59 = vsel %vm1140_vm3, %v1138_v41, %v1139_v36  ;;  %v1172_v50 = vsel %vm1140_vm3, %v1139_v36, %v1108_v6  ;;  %v1051_v39 = vsel %vm1043_vm2, %v1032_v32, %v1033_v9 }
 0x15d   : > { %v4259_v40 = vadd.f32 %v1150_v53, %v1097_v26  ;;  %v4262_v4 = vadd.f32 %v1141_v59, %v4060_v35  ;;  %v4265_v2 = vadd.f32 %v1172_v50, %v4062_v37  ;;  %v1052_v51 = vsel %vm1043_vm2, %v1031_v25, %v1032_v32 }
 0x15e   : > { %v1098_v46 = vadd.f32 %v1052_v51, %v799_v13  ;;  %v1099_v10 = vadd.f32 %v1051_v39, %v803_v57  ;;  %v1142_v6 = vsel %vm1140_vm3, %v1137_v27, %v1138_v41  ;;  %v1143_v7 = vsel %vm1140_vm3, %v1136_v29, %v1137_v27  ;;  %v3282_v9 = vpop.f32.mrb[48].mxu0 }
 0x15f   : > { %v4274_v53 = vadd.f32 %v1143_v7, %v4035_v11  ;;  %v4277_v35 = vadd.f32 %v1142_v6, %v4045_v28  ;;  %v1363_v37 = vpop.f32.mrb[48].mxu1  ;;  %v4279_v8 = vpop.f32.mrb[49].mxu0  ;;  %v1781_v41 = vrot.slane %v3282_v9, 2 }
 0x160   : > { %v4282_v48 = vadd.f32 %v4205_v38, %v1098_v46  ;;  %v4284_v13 = vadd.f32 %v1148_v17, %v1099_v10  ;;  %v4286_v3 = vpop.f32.mrb[49].mxu1  ;;  %v3283_v21 = vpop.f32.mrb[50].mxu0  ;;  %v5070_v28 = vrot.slane %v4279_v8, 2 }
 0x161   : > { %v5069_v25 = vrot.slane %v4286_v3, 1  ;;  %v1367_v49 = vpop.f32.mrb[50].mxu1  ;;  %v1782_v11 = vrot.slane %v3283_v21, 2  ;;  %v1559_v57 = vpop.f32.mrb[51].mxu0 }
 0x162   : > { %v1369_v29 = vpop.f32.mrb[51].mxu1  ;;  %v1780_v33 = vrot.slane %v1559_v57, 2 }
 0x163   : > { %v1839_v62 = vsel %vm1140_vm3, %v1781_v41, %v1782_v11  ;;  %v1684_v38 = vrot.slane %v1369_v29, 1 }
 0x164   : > { %v1840_v17 = vsel %vm1140_vm3, %v1780_v33, %v1781_v41  ;;  %v1841_v42 = vsel %vm1140_vm3, %v5070_v28, %v1780_v33 }
 0x165   : > { %v1745_v36 = vsel %vm1043_vm2, %v5069_v25, %v1684_v38 }
 0x166   : > { %v1747_v32 = vadd.f32 %v1745_v36, %v1363_v37  ;;  %v3286_v43 = vpop.f32.mrb[52].mxu0 }
 0x167   : > { %v1373_v26 = vpop.f32.mrb[52].mxu1  ;;  %v1572_v19 = vpop.f32.mrb[53].mxu0  ;;  %v1785_v51 = vrot.slane %v3286_v43, 2 }
 0x168   : > { %v1843_v27 = vadd.f32 %v1841_v42, %v1747_v32  ;;  %v1375_v59 = vpop.f32.mrb[53].mxu1  ;;  %v1783_v50 = vrot.slane %v1572_v19, 2  ;;  %v3287_v39 = vpop.f32.mrb[54].mxu0 }
 0x169   : > { %v1685_v46 = vrot.slane %v1375_v59, 1  ;;  %v1377_v10 = vpop.f32.mrb[54].mxu1  ;;  %v1786_v6 = vrot.slane %v3287_v39, 2  ;;  %v1575_v7 = vpop.f32.mrb[55].mxu0 }
 0x16a   : > { %v4303_v9 = vadd.f32 %v1843_v27, %v4093_v60  ;;  %v1838_v21 = vsel %vm1140_vm3, %v1782_v11, %v1783_v50  ;;  %v1379_v41 = vpop.f32.mrb[55].mxu1  ;;  %v1784_v37 = vrot.slane %v1575_v7, 2 }
 0x16b   : > { %v1744_v57 = vsel %vm1043_vm2, %v1684_v38, %v1685_v46  ;;  %v4311_v29 = vsel %vm1140_vm3, %v1785_v51, %v1786_v6  ;;  %v1686_v33 = vrot.slane %v1379_v41, 1 }
 0x16c   : > { %5075 = vst [vmem:[#allocation7_spill] sm:$0xff] %v4303_v9  ;;  %v1748_v42 = vadd.f32 %v1744_v57, %v1367_v49  ;;  %v1836_v36 = vsel %vm1140_vm3, %v1784_v37, %v1785_v51  ;;  %v1837_v60 = vsel %vm1140_vm3, %v1783_v50, %v1784_v37 }
 0x16d   : > { %v1743_v11 = vsel %vm1043_vm2, %v1685_v46, %v1686_v33 }
 0x16e   : > { %v1844_v32 = vadd.f32 %v1840_v17, %v1748_v42  ;;  %v1749_v43 = vadd.f32 %v1743_v11, %v1373_v26  ;;  %v3290_v19 = vpop.f32.mrb[56].mxu0 }
 0x16f   : > { %v1383_v27 = vpop.f32.mrb[56].mxu1  ;;  %v1588_v38 = vpop.f32.mrb[57].mxu0  ;;  %v1789_v41 = vrot.slane %v3290_v19, 2 }
 0x170   : > { %v1845_v59 = vadd.f32 %v1839_v62, %v1749_v43  ;;  %v1385_v39 = vpop.f32.mrb[57].mxu1  ;;  %v1787_v7 = vrot.slane %v1588_v38, 2  ;;  %v3291_v25 = vpop.f32.mrb[58].mxu0  ;;  %v4320_v49 = vadd.f32 %v1844_v32, %v4096_v14 }
 0x171   : > { %v1687_v51 = vrot.slane %v1385_v39, 1  ;;  %v1387_v57 = vpop.f32.mrb[58].mxu1  ;;  %v1790_v28 = vrot.slane %v3291_v25, 2  ;;  %v1591_v50 = vpop.f32.mrb[59].mxu0 }
 0x172   : > { %5076 = vst [vmem:[#allocation8_spill] sm:$0xff] %v4320_v49  ;;  %v4324_v46 = vsel %vm1140_vm3, %v1786_v6, %v1787_v7  ;;  %v1389_v17 = vpop.f32.mrb[59].mxu1  ;;  %v1788_v26 = vrot.slane %v1591_v50, 2  ;;  %v4327_v37 = vadd.f32 %v1845_v59, %v4080_v0 }
 0x173   : > { %v1742_v62 = vsel %vm1043_vm2, %v1686_v33, %v1687_v51  ;;  %v4333_v14 = vsel %vm1140_vm3, %v1789_v41, %v1790_v28  ;;  %v1688_v42 = vrot.slane %v1389_v17, 1 }
 0x174   : > { %v1750_v11 = vadd.f32 %v1742_v62, %v1377_v10  ;;  %v4337_v25 = vsel %vm1140_vm3, %v1788_v26, %v1789_v41  ;;  %v1833_v6 = vsel %vm1140_vm3, %v1787_v7, %v1788_v26 }
 0x175   : > { %v1741_v0 = vsel %vm1043_vm2, %v1687_v51, %v1688_v42 }
 0x176   : > { %v1846_v32 = vadd.f32 %v1838_v21, %v1750_v11  ;;  %v1751_v43 = vadd.f32 %v1741_v0, %v1383_v27  ;;  %v3294_v19 = vpop.f32.mrb[60].mxu0 }
 0x177   : > { %v1393_v33 = vpop.f32.mrb[60].mxu1  ;;  %v1604_v38 = vpop.f32.mrb[61].mxu0  ;;  %v1793_v41 = vrot.slane %v3294_v19, 2 }
 0x178   : > { %v1847_v59 = vadd.f32 %v1837_v60, %v1751_v43  ;;  %v1395_v39 = vpop.f32.mrb[61].mxu1  ;;  %v1791_v50 = vrot.slane %v1604_v38, 2  ;;  %v3295_v17 = vpop.f32.mrb[62].mxu0  ;;  %v4344_v10 = vadd.f32 %v1846_v32, %v4105_v31 }
 0x179   : > { %v1689_v62 = vrot.slane %v1395_v39, 1  ;;  %v1397_v49 = vpop.f32.mrb[62].mxu1  ;;  %v1794_v9 = vrot.slane %v3295_v17, 2  ;;  %v1607_v7 = vpop.f32.mrb[63].mxu0 }
 0x17a   : > { %v4348_v51 = vsel %vm1140_vm3, %v1790_v28, %v1791_v50  ;;  %v1399_v21 = vpop.f32.mrb[63].mxu1  ;;  %v1792_v27 = vrot.slane %v1607_v7, 2  ;;  %v4351_v26 = vadd.f32 %v1847_v59, %v4123_v44 }
 0x17b   : > { %v1740_v60 = vsel %vm1043_vm2, %v1688_v42, %v1689_v62  ;;  %v4357_v31 = vsel %vm1140_vm3, %v1793_v41, %v1794_v9  ;;  %v1690_v11 = vrot.slane %v1399_v21, 1 }
 0x17c   : > { %5077 = vst [vmem:[#allocation9_spill] sm:$0xff] %v4351_v26  ;;  %v1752_v0 = vadd.f32 %v1740_v60, %v1387_v57  ;;  %v4361_v32 = vsel %vm1140_vm3, %v1792_v27, %v1793_v41  ;;  %v4365_v28 = vsel %vm1140_vm3, %v1791_v50, %v1792_v27 }
 0x17d   : > { %v1739_v44 = vsel %vm1043_vm2, %v1689_v62, %v1690_v11 }
 0x17e   : > { %v1848_v43 = vadd.f32 %v1836_v36, %v1752_v0  ;;  %v1753_v19 = vadd.f32 %v1739_v44, %v1393_v33  ;;  %v3298_v42 = vpop.f32.mrb[64].mxu0 }
 0x17f   : > { %v1403_v38 = vpop.f32.mrb[64].mxu1  ;;  %v1620_v59 = vpop.f32.mrb[65].mxu0  ;;  %v1797_v21 = vrot.slane %v3298_v42, 2 }
 0x180   : > { %v1849_v39 = vadd.f32 %v4311_v29, %v1753_v19  ;;  %v1405_v17 = vpop.f32.mrb[65].mxu1  ;;  %v1795_v57 = vrot.slane %v1620_v59, 2  ;;  %v3299_v7 = vpop.f32.mrb[66].mxu0  ;;  %v4371_v41 = vadd.f32 %v1848_v43, %v4126_v47 }
 0x181   : > { %v1691_v60 = vrot.slane %v1405_v17, 1  ;;  %v1407_v50 = vpop.f32.mrb[66].mxu1  ;;  %v1798_v27 = vrot.slane %v3299_v7, 2  ;;  %v1623_v26 = vpop.f32.mrb[67].mxu0 }
 0x182   : > { %5078 = vst [vmem:[#allocation10_spill] sm:$0xff] %v4371_v41  ;;  %v4375_v36 = vsel %vm1140_vm3, %v1794_v9, %v1795_v57  ;;  %v1409_v33 = vpop.f32.mrb[67].mxu1  ;;  %v1796_v62 = vrot.slane %v1623_v26, 2  ;;  %v4378_v0 = vadd.f32 %v1849_v39, %v4114_v58 }
 0x183   : > { %v1738_v29 = vsel %vm1043_vm2, %v1690_v11, %v1691_v60  ;;  %v4384_v47 = vsel %vm1140_vm3, %v1797_v21, %v1798_v27  ;;  %v1692_v44 = vrot.slane %v1409_v33, 1 }
 0x184   : > { %5079 = vst [vmem:[#allocation11_spill] sm:$0xff] %v4378_v0  ;;  %v1754_v43 = vadd.f32 %v1738_v29, %v1397_v49  ;;  %v4388_v19 = vsel %vm1140_vm3, %v1796_v62, %v1797_v21  ;;  %v4392_v9 = vsel %vm1140_vm3, %v1795_v57, %v1796_v62 }
 0x185   : > { %v1737_v58 = vsel %vm1043_vm2, %v1691_v60, %v1692_v44 }
 0x186   : > { %v1850_v26 = vadd.f32 %v4324_v46, %v1754_v43  ;;  %v1755_v11 = vadd.f32 %v1737_v58, %v1403_v38  ;;  %v3302_v42 = vpop.f32.mrb[68].mxu0 }
 0x187   : > { %v1413_v59 = vpop.f32.mrb[68].mxu1  ;;  %v1636_v39 = vpop.f32.mrb[69].mxu0  ;;  %v1801_v29 = vrot.slane %v3302_v42, 2 }
 0x188   : > { %v1851_v17 = vadd.f32 %v1833_v6, %v1755_v11  ;;  %v1415_v7 = vpop.f32.mrb[69].mxu1  ;;  %v1799_v49 = vrot.slane %v1636_v39, 2  ;;  %v3303_v33 = vpop.f32.mrb[70].mxu0  ;;  %v4398_v21 = vadd.f32 %v1850_v26, %v4134_v15 }
 0x189   : > { %v1693_v41 = vrot.slane %v1415_v7, 1  ;;  %v1417_v57 = vpop.f32.mrb[70].mxu1  ;;  %v1802_v62 = vrot.slane %v3303_v33, 2  ;;  %v1639_v0 = vpop.f32.mrb[71].mxu0 }
 0x18a   : > { %5080 = vst [vmem:[#allocation12_spill] sm:$0xff] %v4398_v21  ;;  %v4402_v60 = vsel %vm1140_vm3, %v1798_v27, %v1799_v49  ;;  %v1419_v46 = vpop.f32.mrb[71].mxu1  ;;  %v1800_v38 = vrot.slane %v1639_v0, 2  ;;  %v4405_v43 = vadd.f32 %v1851_v17, %v4152_v22 }
 0x18b   : > { %v1736_v6 = vsel %vm1043_vm2, %v1692_v44, %v1693_v41  ;;  %v4411_v15 = vsel %vm1140_vm3, %v1801_v29, %v1802_v62  ;;  %v1694_v58 = vrot.slane %v1419_v46, 1 }
 0x18c   : > { %5081 = vst [vmem:[#allocation13_spill] sm:$0xff] %v4405_v43  ;;  %v1756_v26 = vadd.f32 %v1736_v6, %v1407_v50  ;;  %v4415_v11 = vsel %vm1140_vm3, %v1800_v38, %v1801_v29  ;;  %v4419_v27 = vsel %vm1140_vm3, %v1799_v49, %v1800_v38 }
 0x18d   : > { %v1735_v22 = vsel %vm1043_vm2, %v1693_v41, %v1694_v58 }
 0x18e   : > { %v1852_v0 = vadd.f32 %v4337_v25, %v1756_v26  ;;  %v1757_v44 = vadd.f32 %v1735_v22, %v1413_v59  ;;  %v3306_v42 = vpop.f32.mrb[72].mxu0 }
 0x18f   : > { %v1423_v39 = vpop.f32.mrb[72].mxu1  ;;  %v1652_v17 = vpop.f32.mrb[73].mxu0  ;;  %v1805_v6 = vrot.slane %v3306_v42, 2 }
 0x190   : > { %v1853_v7 = vadd.f32 %v4333_v14, %v1757_v44  ;;  %v1425_v50 = vpop.f32.mrb[73].mxu1  ;;  %v1803_v33 = vrot.slane %v1652_v17, 2  ;;  %v3307_v46 = vpop.f32.mrb[74].mxu0  ;;  %v4426_v29 = vadd.f32 %v1852_v0, %v4154_v23 }
 0x191   : > { %v1695_v49 = vrot.slane %v1425_v50, 1  ;;  %v1427_v38 = vpop.f32.mrb[74].mxu1  ;;  %v1806_v43 = vrot.slane %v3307_v46, 2  ;;  %v1655_v21 = vpop.f32.mrb[75].mxu0 }
 0x192   : > { %5082 = vst [vmem:[#allocation14_spill] sm:$0xff] %v4426_v29  ;;  %v4430_v25 = vsel %vm1140_vm3, %v1802_v62, %v1803_v33  ;;  %v1429_v41 = vpop.f32.mrb[75].mxu1  ;;  %v1804_v59 = vrot.slane %v1655_v21, 2  ;;  %v4433_v26 = vadd.f32 %v1853_v7, %v4143_v20 }
 0x193   : > { %v1734_v14 = vsel %vm1043_vm2, %v1694_v58, %v1695_v49  ;;  %v4439_v23 = vsel %vm1140_vm3, %v1805_v6, %v1806_v43  ;;  %v1696_v22 = vrot.slane %v1429_v41, 1 }
 0x194   : > { %5083 = vst [vmem:[#allocation15_spill] sm:$0xff] %v4433_v26  ;;  %v1758_v0 = vadd.f32 %v1734_v14, %v1417_v57  ;;  %v4443_v44 = vsel %vm1140_vm3, %v1804_v59, %v1805_v6  ;;  %v4447_v62 = vsel %vm1140_vm3, %v1803_v33, %v1804_v59 }
 0x195   : > { %v1733_v20 = vsel %vm1043_vm2, %v1695_v49, %v1696_v22 }
 0x196   : > { %v1854_v21 = vadd.f32 %v4348_v51, %v1758_v0  ;;  %v1759_v58 = vadd.f32 %v1733_v20, %v1423_v39  ;;  %v3310_v42 = vpop.f32.mrb[76].mxu0  ;;  %v5085_v20 = vrot.slane %v4279_v8, 2 }
 0x197   : > { %v1433_v17 = vpop.f32.mrb[76].mxu1  ;;  %v1668_v7 = vpop.f32.mrb[77].mxu0  ;;  %v1809_v14 = vrot.slane %v3310_v42, 2 }
 0x198   : > { %v1855_v50 = vadd.f32 %v4365_v28, %v1759_v58  ;;  %v1435_v57 = vpop.f32.mrb[77].mxu1  ;;  %v1807_v46 = vrot.slane %v1668_v7, 2  ;;  %v3311_v41 = vpop.f32.mrb[78].mxu0  ;;  %v4454_v6 = vadd.f32 %v1854_v21, %v4161_v30 }
 0x199   : > { %v1697_v33 = vrot.slane %v1435_v57, 1  ;;  %v1437_v59 = vpop.f32.mrb[78].mxu1  ;;  %v1810_v29 = vrot.slane %v3311_v41, 2  ;;  %v1671_v26 = vpop.f32.mrb[79].mxu0 }
 0x19a   : > { %v4458_v51 = vsel %vm1140_vm3, %v1806_v43, %v1807_v46  ;;  %v1439_v39 = vpop.f32.mrb[79].mxu1  ;;  %v1808_v49 = vrot.slane %v1671_v26, 2  ;;  %v4461_v0 = vadd.f32 %v1855_v50, %v4175_v54 }
 0x19b   : > { %v1732_v28 = vsel %vm1043_vm2, %v1696_v22, %v1697_v33  ;;  %v4467_v30 = vsel %vm1140_vm3, %v1809_v14, %v1810_v29  ;;  %v4473_v21 = vsel %vm1140_vm3, %v1810_v29, %v5085_v20  ;;  %v1698_v43 = vrot.slane %v1439_v39, 1 }
 0x19c   : > { %5084 = vst [vmem:[#allocation16_spill] sm:$0xff] %v4461_v0  ;;  %v1760_v58 = vadd.f32 %v1732_v28, %v1427_v38  ;;  %v4477_v26 = vsel %vm1140_vm3, %v1808_v49, %v1809_v14  ;;  %v4481_v54 = vsel %vm1140_vm3, %v1807_v46, %v1808_v49 }
 0x19d   : > { %v1731_v22 = vsel %vm1043_vm2, %v1697_v33, %v1698_v43 }
 0x19e   : > { %v1856_v42 = vadd.f32 %v4361_v32, %v1760_v58  ;;  %v1761_v8 = vadd.f32 %v1731_v22, %v1433_v17  ;;  %v2097_v7 = vpop.f32.mrb[80].mxu0 }
 0x19f   : > { %v1443_v50 = vpop.f32.mrb[80].mxu1  ;;  %v4486_v29 = vpop.f32.mrb[81].mxu0 }
 0x1a0   : > { %5086 = vst [vmem:[#allocation17_spill] sm:$0xff] %v4486_v29  ;;  %v1857_v38 = vadd.f32 %v4357_v31, %v1761_v8  ;;  %v1445_v57 = vpop.f32.mrb[81].mxu1  ;;  %v2101_v41 = vpop.f32.mrb[82].mxu0  ;;  %v4490_v14 = vadd.f32 %v1856_v42, %v4177_v61  ;;  %v5072_v28 = vrot.slane %v4486_v29, 1 }
 0x1a1   : > { %v1699_v39 = vrot.slane %v1445_v57, 1  ;;  %v1447_v46 = vpop.f32.mrb[82].mxu1  ;;  %v2103_v49 = vpop.f32.mrb[83].mxu0 }
 0x1a2   : > { %5087 = vst [vmem:[#allocation18_spill] sm:$0xff] %v4490_v14  ;;  %v1449_v33 = vpop.f32.mrb[83].mxu1  ;;  %v2418_v20 = vrot.slane %v2103_v49, 1  ;;  %v4494_v32 = vadd.f32 %v1857_v38, %v4179_v45 }
 0x1a3   : > { %v1730_v17 = vsel %vm1043_vm2, %v1698_v43, %v1699_v39  ;;  %v1700_v58 = vrot.slane %v1449_v33, 1 }
 0x1a4   : > { %v1762_v31 = vadd.f32 %v1730_v17, %v1437_v59  ;;  %v2479_v61 = vsel %vm1043_vm2, %v5072_v28, %v2418_v20 }
 0x1a5   : > { %v1729_v22 = vsel %vm1043_vm2, %v1699_v39, %v1700_v58  ;;  %v4504_v42 = vadd.f32 %v2479_v61, %v2097_v7 }
 0x1a6   : > { %v1858_v8 = vadd.f32 %v4375_v36, %v1762_v31  ;;  %v1763_v57 = vadd.f32 %v1729_v22, %v1443_v50  ;;  %v2107_v45 = vpop.f32.mrb[84].mxu0 }
 0x1a7   : > { %v1453_v38 = vpop.f32.mrb[84].mxu1  ;;  %v2109_v49 = vpop.f32.mrb[85].mxu0 }
 0x1a8   : > { %v1859_v43 = vadd.f32 %v4392_v9, %v1763_v57  ;;  %v1455_v33 = vpop.f32.mrb[85].mxu1  ;;  %v2419_v59 = vrot.slane %v2109_v49, 1  ;;  %v2111_v17 = vpop.f32.mrb[86].mxu0  ;;  %v4509_v29 = vadd.f32 %v1858_v8, %v4191_v34 }
 0x1a9   : > { %v1701_v28 = vrot.slane %v1455_v33, 1  ;;  %v1457_v14 = vpop.f32.mrb[86].mxu1  ;;  %v2113_v0 = vpop.f32.mrb[87].mxu0 }
 0x1aa   : > { %v2478_v7 = vsel %vm1043_vm2, %v2418_v20, %v2419_v59  ;;  %v1459_v39 = vpop.f32.mrb[87].mxu1  ;;  %v2420_v36 = vrot.slane %v2113_v0, 1  ;;  %v4514_v50 = vadd.f32 %v1859_v43, %v4197_v63 }
 0x1ab   : > { %v1728_v9 = vsel %vm1043_vm2, %v1700_v58, %v1701_v28  ;;  %v4518_v31 = vadd.f32 %v2478_v7, %v2101_v41  ;;  %v1702_v61 = vrot.slane %v1459_v39, 1 }
 0x1ac   : > { %v1764_v22 = vadd.f32 %v1728_v9, %v1447_v46  ;;  %v2477_v34 = vsel %vm1043_vm2, %v2419_v59, %v2420_v36 }
 0x1ad   : > { %v1727_v8 = vsel %vm1043_vm2, %v1701_v28, %v1702_v61  ;;  %v4524_v57 = vadd.f32 %v2477_v34, %v2107_v45 }
 0x1ae   : > { %v1860_v0 = vadd.f32 %v4388_v19, %v1764_v22  ;;  %v1765_v20 = vadd.f32 %v1727_v8, %v1453_v38  ;;  %v2117_v63 = vpop.f32.mrb[88].mxu0 }
 0x1af   : > { %v1463_v49 = vpop.f32.mrb[88].mxu1  ;;  %v2119_v43 = vpop.f32.mrb[89].mxu0 }
 0x1b0   : > { %v1861_v58 = vadd.f32 %v4384_v47, %v1765_v20  ;;  %v1465_v41 = vpop.f32.mrb[89].mxu1  ;;  %v2421_v33 = vrot.slane %v2119_v43, 1  ;;  %v2121_v7 = vpop.f32.mrb[90].mxu0  ;;  %v4529_v46 = vadd.f32 %v1860_v0, %v4209_v18 }
 0x1b1   : > { %v1703_v59 = vrot.slane %v1465_v41, 1  ;;  %v1467_v39 = vpop.f32.mrb[90].mxu1  ;;  %v2123_v9 = vpop.f32.mrb[91].mxu0 }
 0x1b2   : > { %v2476_v28 = vsel %vm1043_vm2, %v2420_v36, %v2421_v33  ;;  %v1469_v45 = vpop.f32.mrb[91].mxu1  ;;  %v2422_v19 = vrot.slane %v2123_v9, 1  ;;  %v4534_v38 = vadd.f32 %v1861_v58, %v4215_v24 }
 0x1b3   : > { %v1726_v47 = vsel %vm1043_vm2, %v1702_v61, %v1703_v59  ;;  %v4538_v22 = vadd.f32 %v2476_v28, %v2111_v17  ;;  %v1704_v34 = vrot.slane %v1469_v45, 1 }
 0x1b4   : > { %v1766_v8 = vadd.f32 %v1726_v47, %v1457_v14  ;;  %v2475_v18 = vsel %vm1043_vm2, %v2421_v33, %v2422_v19 }
 0x1b5   : > { %v1725_v0 = vsel %vm1043_vm2, %v1703_v59, %v1704_v34  ;;  %v4544_v20 = vadd.f32 %v2475_v18, %v2117_v63 }
 0x1b6   : > { %v1862_v36 = vadd.f32 %v4402_v60, %v1766_v8  ;;  %v1767_v43 = vadd.f32 %v1725_v0, %v1463_v49  ;;  %v2127_v24 = vpop.f32.mrb[92].mxu0 }
 0x1b7   : > { %v1473_v58 = vpop.f32.mrb[92].mxu1  ;;  %v2129_v41 = vpop.f32.mrb[93].mxu0 }
 0x1b8   : > { %v1863_v61 = vadd.f32 %v4419_v27, %v1767_v43  ;;  %v1475_v17 = vpop.f32.mrb[93].mxu1  ;;  %v2423_v9 = vrot.slane %v2129_v41, 1  ;;  %v2131_v28 = vpop.f32.mrb[94].mxu0  ;;  %v4549_v14 = vadd.f32 %v1862_v36, %v4225_v52 }
 0x1b9   : > { %v1705_v33 = vrot.slane %v1475_v17, 1  ;;  %v1477_v45 = vpop.f32.mrb[94].mxu1  ;;  %v2133_v47 = vpop.f32.mrb[95].mxu0 }
 0x1ba   : > { %v2474_v63 = vsel %vm1043_vm2, %v2422_v19, %v2423_v9  ;;  %v1479_v59 = vpop.f32.mrb[95].mxu1  ;;  %v2424_v60 = vrot.slane %v2133_v47, 1  ;;  %v4554_v49 = vadd.f32 %v1863_v61, %v4237_v16 }
 0x1bb   : > { %v1724_v27 = vsel %vm1043_vm2, %v1704_v34, %v1705_v33  ;;  %v4558_v8 = vadd.f32 %v2474_v63, %v2121_v7  ;;  %v1706_v18 = vrot.slane %v1479_v59, 1 }
 0x1bc   : > { %v1768_v0 = vadd.f32 %v1724_v27, %v1467_v39  ;;  %v2473_v52 = vsel %vm1043_vm2, %v2423_v9, %v2424_v60 }
 0x1bd   : > { %v1723_v36 = vsel %vm1043_vm2, %v1705_v33, %v1706_v18  ;;  %v4564_v43 = vadd.f32 %v2473_v52, %v2127_v24 }
 0x1be   : > { %v1864_v19 = vadd.f32 %v4415_v11, %v1768_v0  ;;  %v1769_v41 = vadd.f32 %v1723_v36, %v1473_v58  ;;  %v2137_v16 = vpop.f32.mrb[96].mxu0 }
 0x1bf   : > { %v1483_v61 = vpop.f32.mrb[96].mxu1  ;;  %v2139_v17 = vpop.f32.mrb[97].mxu0 }
 0x1c0   : > { %v1865_v34 = vadd.f32 %v4411_v15, %v1769_v41  ;;  %v1485_v7 = vpop.f32.mrb[97].mxu1  ;;  %v2425_v47 = vrot.slane %v2139_v17, 1  ;;  %v2141_v63 = vpop.f32.mrb[98].mxu0  ;;  %v4569_v39 = vadd.f32 %v1864_v19, %v4259_v40 }
 0x1c1   : > { %v1707_v9 = vrot.slane %v1485_v7, 1  ;;  %v1487_v59 = vpop.f32.mrb[98].mxu1  ;;  %v2143_v27 = vpop.f32.mrb[99].mxu0 }
 0x1c2   : > { %v2472_v24 = vsel %vm1043_vm2, %v2424_v60, %v2425_v47  ;;  %v1489_v33 = vpop.f32.mrb[99].mxu1  ;;  %v2426_v11 = vrot.slane %v2143_v27, 1  ;;  %v4574_v58 = vadd.f32 %v1865_v34, %v4282_v48 }
 0x1c3   : > { %v1722_v15 = vsel %vm1043_vm2, %v1706_v18, %v1707_v9  ;;  %v4578_v0 = vadd.f32 %v2472_v24, %v2131_v28  ;;  %v1708_v52 = vrot.slane %v1489_v33, 1 }
 0x1c4   : > { %v1770_v36 = vadd.f32 %v1722_v15, %v1477_v45  ;;  %v2471_v40 = vsel %vm1043_vm2, %v2425_v47, %v2426_v11 }
 0x1c5   : > { %v1721_v19 = vsel %vm1043_vm2, %v1707_v9, %v1708_v52  ;;  %v4584_v41 = vadd.f32 %v2471_v40, %v2137_v16 }
 0x1c6   : > { %v1866_v60 = vadd.f32 %v4430_v25, %v1770_v36  ;;  %v1771_v17 = vadd.f32 %v1721_v19, %v1483_v61  ;;  %v2147_v48 = vpop.f32.mrb[100].mxu0 }
 0x1c7   : > { %v1493_v34 = vpop.f32.mrb[100].mxu1  ;;  %v2149_v7 = vpop.f32.mrb[101].mxu0 }
 0x1c8   : > { %v1867_v18 = vadd.f32 %v4447_v62, %v1771_v17  ;;  %v1495_v28 = vpop.f32.mrb[101].mxu1  ;;  %v2427_v27 = vrot.slane %v2149_v7, 1  ;;  %v2151_v24 = vpop.f32.mrb[102].mxu0  ;;  %v4589_v45 = vadd.f32 %v1866_v60, %v4284_v13 }
 0x1c9   : > { %v1709_v47 = vrot.slane %v1495_v28, 1  ;;  %v1497_v33 = vpop.f32.mrb[102].mxu1  ;;  %v2153_v15 = vpop.f32.mrb[103].mxu0 }
 0x1ca   : > { %v2470_v16 = vsel %vm1043_vm2, %v2426_v11, %v2427_v27  ;;  %v1499_v9 = vpop.f32.mrb[103].mxu1  ;;  %v2428_v25 = vrot.slane %v2153_v15, 1  ;;  %v4594_v61 = vadd.f32 %v1867_v18, %v4240_v56 }
 0x1cb   : > { %v1720_v62 = vsel %vm1043_vm2, %v1708_v52, %v1709_v47  ;;  %v4598_v36 = vadd.f32 %v2470_v16, %v2141_v63  ;;  %v1710_v40 = vrot.slane %v1499_v9, 1 }
 0x1cc   : > { %v1772_v19 = vadd.f32 %v1720_v62, %v1487_v59  ;;  %v2469_v13 = vsel %vm1043_vm2, %v2427_v27, %v2428_v25 }
 0x1cd   : > { %v1719_v60 = vsel %vm1043_vm2, %v1709_v47, %v1710_v40  ;;  %v4604_v17 = vadd.f32 %v2469_v13, %v2147_v48 }
 0x1ce   : > { %v1868_v11 = vadd.f32 %v4443_v44, %v1772_v19  ;;  %v1773_v7 = vadd.f32 %v1719_v60, %v1493_v34  ;;  %v2157_v56 = vpop.f32.mrb[104].mxu0 }
 0x1cf   : > { %v1503_v18 = vpop.f32.mrb[104].mxu1  ;;  %v2159_v28 = vpop.f32.mrb[105].mxu0 }
 0x1d0   : > { %v1869_v52 = vadd.f32 %v4439_v23, %v1773_v7  ;;  %v1505_v63 = vpop.f32.mrb[105].mxu1  ;;  %v2429_v15 = vrot.slane %v2159_v28, 1  ;;  %v2161_v16 = vpop.f32.mrb[106].mxu0  ;;  %v4609_v59 = vadd.f32 %v1868_v11, %v4235_v55 }
 0x1d1   : > { %v1711_v27 = vrot.slane %v1505_v63, 1  ;;  %v1507_v9 = vpop.f32.mrb[106].mxu1  ;;  %v2163_v62 = vpop.f32.mrb[107].mxu0 }
 0x1d2   : > { %v2468_v48 = vsel %vm1043_vm2, %v2428_v25, %v2429_v15  ;;  %v1509_v47 = vpop.f32.mrb[107].mxu1  ;;  %v2430_v44 = vrot.slane %v2163_v62, 1  ;;  %v4614_v34 = vadd.f32 %v1869_v52, %v4228_v1 }
 0x1d3   : > { %v1718_v23 = vsel %vm1043_vm2, %v1710_v40, %v1711_v27  ;;  %v4618_v19 = vadd.f32 %v2468_v48, %v2151_v24  ;;  %v1712_v13 = vrot.slane %v1509_v47, 1 }
 0x1d4   : > { %v1774_v60 = vadd.f32 %v1718_v23, %v1497_v33  ;;  %v2467_v55 = vsel %vm1043_vm2, %v2429_v15, %v2430_v44 }
 0x1d5   : > { %v1717_v11 = vsel %vm1043_vm2, %v1711_v27, %v1712_v13  ;;  %v4624_v7 = vadd.f32 %v2467_v55, %v2157_v56 }
 0x1d6   : > { %v1870_v25 = vadd.f32 %v4458_v51, %v1774_v60  ;;  %v1775_v28 = vadd.f32 %v1717_v11, %v1503_v18  ;;  %v2167_v1 = vpop.f32.mrb[108].mxu0 }
 0x1d7   : > { %v1513_v52 = vpop.f32.mrb[108].mxu1  ;;  %v2169_v63 = vpop.f32.mrb[109].mxu0 }
 0x1d8   : > { %v1871_v40 = vadd.f32 %v4481_v54, %v1775_v28  ;;  %v1515_v24 = vpop.f32.mrb[109].mxu1  ;;  %v2431_v62 = vrot.slane %v2169_v63, 1  ;;  %v2171_v48 = vpop.f32.mrb[110].mxu0  ;;  %v4629_v33 = vadd.f32 %v1870_v25, %v4247_v12 }
 0x1d9   : > { %v1713_v15 = vrot.slane %v1515_v24, 1  ;;  %v1517_v47 = vpop.f32.mrb[110].mxu1  ;;  %v2173_v23 = vpop.f32.mrb[111].mxu0 }
 0x1da   : > { %v2466_v56 = vsel %vm1043_vm2, %v2430_v44, %v2431_v62  ;;  %v1519_v27 = vpop.f32.mrb[111].mxu1  ;;  %v2432_v51 = vrot.slane %v2173_v23, 1  ;;  %v4634_v18 = vadd.f32 %v1871_v40, %v4274_v53  ;;  %v5088_v44 = vrot.slane %v4286_v3, 1 }
 0x1db   : > { %v1716_v54 = vsel %vm1043_vm2, %v1712_v13, %v1713_v15  ;;  %v4638_v60 = vadd.f32 %v2466_v56, %v2161_v16  ;;  %v1714_v55 = vrot.slane %v1519_v27, 1 }
 0x1dc   : > { %v1776_v11 = vadd.f32 %v1716_v54, %v1507_v9  ;;  %v2465_v12 = vsel %vm1043_vm2, %v2431_v62, %v2432_v51 }
 0x1dd   : > { %v1715_v25 = vsel %vm1043_vm2, %v1713_v15, %v1714_v55  ;;  %v1746_v28 = vsel %vm1043_vm2, %v1714_v55, %v5088_v44  ;;  %v4648_v53 = vadd.f32 %v2465_v12, %v2167_v1 }
 0x1de   : > { %v1872_v63 = vadd.f32 %v4477_v26, %v1776_v11  ;;  %v1777_v13 = vadd.f32 %v1715_v25, %v1513_v52  ;;  %v1778_v16 = vadd.f32 %v1746_v28, %v1517_v47  ;;  %v2177_v40 = vpop.f32.mrb[112].mxu0 }
 0x1df   : > { %v3316_v24 = vpop.f32.mrb[112].mxu1  ;;  %v2179_v9 = vpop.f32.mrb[113].mxu0 }
 0x1e0   : > { %v1873_v23 = vadd.f32 %v4467_v30, %v1777_v13  ;;  %v1874_v62 = vadd.f32 %v4473_v21, %v1778_v16  ;;  %v2515_v56 = vrot.slane %v3316_v24, 2  ;;  %v2433_v15 = vrot.slane %v2179_v9, 1  ;;  %v4653_v27 = vpop.f32.mrb[113].mxu1  ;;  %v2181_v3 = vpop.f32.mrb[114].mxu0 }
 0x1e1   : > { %v2513_v54 = vrot.slane %v4653_v27, 2  ;;  %v3317_v1 = vpop.f32.mrb[114].mxu1  ;;  %v2183_v55 = vpop.f32.mrb[115].mxu0  ;;  %v4657_v26 = vadd.f32 %v1872_v63, %v4277_v35 }
 0x1e2   : > { %v4660_v52 = vadd.f32 %v1873_v23, %v4262_v4  ;;  %v4663_v30 = vadd.f32 %v1874_v62, %v4265_v2  ;;  %v2464_v21 = vsel %vm1043_vm2, %v2432_v51, %v2433_v15  ;;  %v2516_v47 = vrot.slane %v3317_v1, 2  ;;  %v2293_v11 = vpop.f32.mrb[115].mxu1  ;;  %v4694_v62 = vld [vmem:[%s5067_s4] ss:$0 sm:$0xff]  ;;  %v5090_v1 = vld [vmem:[#allocation8_spill] sm:$0xff] }
 0x1e3   : > { %v4667_v12 = vadd.f32 %v2464_v21, %v2171_v48  ;;  %v2434_v25 = vrot.slane %v2183_v55, 1  ;;  %v2514_v44 = vrot.slane %v2293_v11, 2  ;;  %v4684_v48 = vld [vmem:[%s5066_s3] ss:$0 sm:$0xff] }
 0x1e4   : > { %v2573_v28 = vsel %vm1140_vm3, %v2515_v56, %v2516_v47 }
 0x1e5   : > { %v2579_v35 = vadd.f32 %v2573_v28, %v4524_v57  ;;  %v2463_v4 = vsel %vm1043_vm2, %v2433_v15, %v2434_v25  ;;  %v2574_v2 = vsel %vm1140_vm3, %v2514_v44, %v2515_v56  ;;  %v2575_v51 = vsel %vm1140_vm3, %v2513_v54, %v2514_v44  ;;  %v5089_v56 = vld [vmem:[#allocation7_spill] sm:$0xff] }
 0x1e6   : > { %v4686_v63 = vadd.f32 %v2463_v4, %v2177_v40  ;;  %v2577_v57 = vadd.f32 %v2575_v51, %v4504_v42  ;;  %v2578_v13 = vadd.f32 %v2574_v2, %v4518_v31  ;;  %v2187_v16 = vpop.f32.mrb[116].mxu0 }
 0x1e7   : > { %v2643_v24 = vadd.f32 %v2579_v35, %v4327_v37  ;;  %v3320_v9 = vpop.f32.mrb[116].mxu1  ;;  %v2189_v23 = vpop.f32.mrb[117].mxu0 }
 0x1e8   : > { %v2641_v15 = vadd.f32 %v2577_v57, %v5089_v56  ;;  %v2642_v55 = vadd.f32 %v2578_v13, %v5090_v1  ;;  %v2519_v40 = vrot.slane %v3320_v9, 2  ;;  %v2435_v21 = vrot.slane %v2189_v23, 1  ;;  %v2306_v11 = vpop.f32.mrb[117].mxu1  ;;  %v2191_v42 = vpop.f32.mrb[118].mxu0 }
 0x1e9   : > { %v2746_v31 = vmul.f32 %v4684_v48, %v2643_v24  ;;  %v2517_v37 = vrot.slane %v2306_v11, 2  ;;  %v3321_v44 = vpop.f32.mrb[118].mxu1  ;;  %v2193_v28 = vpop.f32.mrb[119].mxu0 }
 0x1ea   : > { %v2744_v35 = vmul.f32 %v4684_v48, %v2641_v15  ;;  %v2745_v4 = vmul.f32 %v4684_v48, %v2642_v55  ;;  %v2462_v2 = vsel %vm1043_vm2, %v2434_v25, %v2435_v21  ;;  %v2520_v51 = vrot.slane %v3321_v44, 2  ;;  %v2309_v57 = vpop.f32.mrb[119].mxu1 }
 0x1eb   : > { %v2785_v13 = vadd.f32 %v4694_v62, %v2746_v31  ;;  %v4706_v9 = vadd.f32 %v2462_v2, %v2181_v3  ;;  %v2572_v23 = vsel %vm1140_vm3, %v2516_v47, %v2517_v37  ;;  %v2436_v24 = vrot.slane %v2193_v28, 1 }
 0x1ec   : > { %v2783_v56 = vadd.f32 %v4694_v62, %v2744_v35  ;;  %v2784_v1 = vadd.f32 %v4694_v62, %v2745_v4  ;;  %v2580_v15 = vadd.f32 %v2572_v23, %v4538_v22  ;;  %v2569_v55 = vsel %vm1140_vm3, %v2519_v40, %v2520_v51  ;;  %v5091_v22 = vld [vmem:[#allocation11_spill] sm:$0xff] }
 0x1ed   : > { %v2817_v25 = vmax.f32 %v2785_v13, 0.0  ;;  %v2583_v11 = vadd.f32 %v2569_v55, %v4564_v43  ;;  %v2461_v3 = vsel %vm1043_vm2, %v2435_v21, %v2436_v24  ;;  %v2518_v31 = vrot.slane %v2309_v57, 2 }
 0x1ee   : > { %v2815_v44 = vmax.f32 %v2783_v56, 0.0  ;;  %v2816_v2 = vmax.f32 %v2784_v1, 0.0  ;;  %v2644_v47 = vadd.f32 %v2580_v15, %v4344_v10  ;;  %v4719_v28 = vadd.f32 %v2461_v3, %v2187_v16  ;;  %v2197_v35 = vpop.f32.mrb[120].mxu0 }
 0x1ef   : > { %2849 = vst [vmem:[%s4721_s16 + $0x10] sm:$0xff] %v2817_v25  ;;  %v2647_v4 = vadd.f32 %v2583_v11, %v5091_v22  ;;  %v2570_v43 = vsel %vm1140_vm3, %v2518_v31, %v2519_v40  ;;  %v2571_v21 = vsel %vm1140_vm3, %v2517_v37, %v2518_v31  ;;  %v3324_v57 = vpop.f32.mrb[120].mxu1  ;;  %v2199_v13 = vpop.f32.mrb[121].mxu0  ;;  %v5092_v31 = vld [vmem:[#allocation9_spill] sm:$0xff] }
 0x1f0   : > { %2847 = vst [vmem:[%s4721_s16] sm:$0xff] %v2815_v44  ;;  %2848 = vst [vmem:[%s4721_s16 + $0x8] sm:$0xff] %v2816_v2  ;;  %v2747_v10 = vmul.f32 %v4684_v48, %v2644_v47  ;;  %v2581_v16 = vadd.f32 %v2571_v21, %v4544_v20  ;;  %v2582_v23 = vadd.f32 %v2570_v43, %v4558_v8  ;;  %v2322_v56 = vpop.f32.mrb[121].mxu1  ;;  %v2201_v1 = vpop.f32.mrb[122].mxu0  ;;  %v2523_v55 = vrot.slane %v3324_v57, 2  ;;  %v5093_v2 = vld [vmem:[#allocation10_spill] sm:$0xff] }
 0x1f1   : > { %v2750_v15 = vmul.f32 %v4684_v48, %v2647_v4  ;;  %v2437_v25 = vrot.slane %v2199_v13, 1  ;;  %v2521_v40 = vrot.slane %v2322_v56, 2  ;;  %v3325_v11 = vpop.f32.mrb[122].mxu1  ;;  %v2203_v3 = vpop.f32.mrb[123].mxu0 }
 0x1f2   : > { %v2786_v37 = vadd.f32 %v4694_v62, %v2747_v10  ;;  %v2645_v44 = vadd.f32 %v2581_v16, %v5092_v31  ;;  %v2646_v47 = vadd.f32 %v2582_v23, %v5093_v2  ;;  %v2524_v22 = vrot.slane %v3325_v11, 2  ;;  %v2325_v20 = vpop.f32.mrb[123].mxu1  ;;  %v5094_v31 = vld [vmem:[#allocation12_spill] sm:$0xff] }
 0x1f3   : > { %v2789_v8 = vadd.f32 %v4694_v62, %v2750_v15  ;;  %v2460_v43 = vsel %vm1043_vm2, %v2436_v24, %v2437_v25  ;;  %v2568_v4 = vsel %vm1140_vm3, %v2520_v51, %v2521_v40  ;;  %v2438_v21 = vrot.slane %v2203_v3, 1 }
 0x1f4   : > { %v2818_v57 = vmax.f32 %v2786_v37, 0.0  ;;  %v2748_v13 = vmul.f32 %v4684_v48, %v2645_v44  ;;  %v2749_v10 = vmul.f32 %v4684_v48, %v2646_v47  ;;  %v4745_v16 = vadd.f32 %v2460_v43, %v2191_v42  ;;  %v5095_v43 = vld [vmem:[#allocation15_spill] sm:$0xff] }
 0x1f5   : > { %v2821_v23 = vmax.f32 %v2789_v8, 0.0  ;;  %v2584_v56 = vadd.f32 %v2568_v4, %v4578_v0  ;;  %v2565_v15 = vsel %vm1140_vm3, %v2523_v55, %v2524_v22  ;;  %v2459_v24 = vsel %vm1043_vm2, %v2437_v25, %v2438_v21 }
 0x1f6   : > { %2850 = vst [vmem:[%s4721_s16 + $0x18] sm:$0xff] %v2818_v57  ;;  %v2787_v51 = vadd.f32 %v4694_v62, %v2748_v13  ;;  %v2788_v11 = vadd.f32 %v4694_v62, %v2749_v10  ;;  %v2587_v3 = vadd.f32 %v2565_v15, %v4604_v17  ;;  %v4756_v37 = vadd.f32 %v2459_v24, %v2197_v35  ;;  %v2207_v42 = vpop.f32.mrb[124].mxu0 }
 0x1f7   : > { %2853 = vst [vmem:[%s4721_s16 + $0x30] sm:$0xff] %v2821_v23  ;;  %v2648_v44 = vadd.f32 %v2584_v56, %v5094_v31  ;;  %v2522_v0 = vrot.slane %v2325_v20, 2  ;;  %v3328_v2 = vpop.f32.mrb[124].mxu1  ;;  %v2209_v47 = vpop.f32.mrb[125].mxu0 }
 0x1f8   : > { %v2819_v8 = vmax.f32 %v2787_v51, 0.0  ;;  %v2820_v25 = vmax.f32 %v2788_v11, 0.0  ;;  %v2651_v4 = vadd.f32 %v2587_v3, %v5095_v43  ;;  %v2527_v57 = vrot.slane %v3328_v2, 2  ;;  %v2338_v13 = vpop.f32.mrb[125].mxu1  ;;  %v4761_v10 = vpop.f32.mrb[126].mxu0 }
 0x1f9   : > { %v2751_v17 = vmul.f32 %v4684_v48, %v2648_v44  ;;  %v2566_v35 = vsel %vm1140_vm3, %v2522_v0, %v2523_v55  ;;  %v2567_v23 = vsel %vm1140_vm3, %v2521_v40, %v2522_v0  ;;  %v2439_v20 = vrot.slane %v2209_v47, 1  ;;  %v4768_v56 = vpop.f32.mrb[126].mxu1  ;;  %v2213_v15 = vpop.f32.mrb[127].mxu0  ;;  %v5096_v47 = vld [vmem:[#allocation13_spill] sm:$0xff] }
 0x1fa   : > { %2851 = vst [vmem:[%s4721_s16 + $0x20] sm:$0xff] %v2819_v8  ;;  %2852 = vst [vmem:[%s4721_s16 + $0x28] sm:$0xff] %v2820_v25  ;;  %v2754_v24 = vmul.f32 %v4684_v48, %v2651_v4  ;;  %v2585_v51 = vadd.f32 %v2567_v23, %v4584_v41  ;;  %v2586_v11 = vadd.f32 %v2566_v35, %v4598_v36  ;;  %v2525_v3 = vrot.slane %v2338_v13, 2  ;;  %v2341_v31 = vpop.f32.mrb[127].mxu1  ;;  %v5097_v25 = vld [vmem:[#allocation14_spill] sm:$0xff] }
 0x1fb   : > { %v2790_v44 = vadd.f32 %v4694_v62, %v2751_v17  ;;  %v2458_v55 = vsel %vm1043_vm2, %v2438_v21, %v2439_v20  ;;  %v2528_v40 = vrot.slane %v4768_v56, 2  ;;  %v2440_v0 = vrot.slane %v2213_v15, 1 }
 0x1fc   : > { %v2793_v2 = vadd.f32 %v4694_v62, %v2754_v24  ;;  %v2649_v8 = vadd.f32 %v2585_v51, %v5096_v47  ;;  %v2650_v43 = vadd.f32 %v2586_v11, %v5097_v25  ;;  %v4782_v41 = vadd.f32 %v2458_v55, %v2201_v1 }
 0x1fd   : > { %v2822_v36 = vmax.f32 %v2790_v44, 0.0  ;;  %v2564_v4 = vsel %vm1140_vm3, %v2524_v22, %v2525_v3  ;;  %v2561_v21 = vsel %vm1140_vm3, %v2527_v57, %v2528_v40  ;;  %v2457_v13 = vsel %vm1043_vm2, %v2439_v20, %v2440_v0 }
 0x1fe   : > { %v2825_v17 = vmax.f32 %v2793_v2, 0.0  ;;  %v2752_v35 = vmul.f32 %v4684_v48, %v2649_v8  ;;  %v2753_v23 = vmul.f32 %v4684_v48, %v2650_v43  ;;  %v2588_v56 = vadd.f32 %v2564_v4, %v4618_v19  ;;  %v2217_v1 = vpop.f32.mrb[128].mxu0 }
 0x1ff   : > { %2854 = vst [vmem:[%s4721_s16 + $0x38] sm:$0xff] %v2822_v36  ;;  %v2591_v15 = vadd.f32 %v2561_v21, %v4648_v53  ;;  %v4795_v24 = vadd.f32 %v2457_v13, %v2207_v42  ;;  %v2526_v22 = vrot.slane %v2341_v31, 2  ;;  %v4797_v51 = vpop.f32.mrb[128].mxu1  ;;  %v2219_v11 = vpop.f32.mrb[129].mxu0 }
 0x200   : > { %2857 = vst [vmem:[%s4721_s16 + $0x50] sm:$0xff] %v2825_v17  ;;  %v2791_v20 = vadd.f32 %v4694_v62, %v2752_v35  ;;  %v2792_v44 = vadd.f32 %v4694_v62, %v2753_v23  ;;  %v2652_v55 = vadd.f32 %v2588_v56, %v4454_v6  ;;  %v2531_v2 = vrot.slane %v4797_v51, 2  ;;  %v2354_v19 = vpop.f32.mrb[129].mxu1  ;;  %v4804_v47 = vpop.f32.mrb[130].mxu0  ;;  %v5098_v23 = vld [vmem:[#allocation16_spill] sm:$0xff]  ;;  %v5099_v51 = vld [vmem:[#allocation18_spill] sm:$0xff] }
 0x201   : > { %v2655_v53 = vadd.f32 %v2591_v15, %v4494_v32  ;;  %v2562_v42 = vsel %vm1140_vm3, %v2526_v22, %v2527_v57  ;;  %v2563_v31 = vsel %vm1140_vm3, %v2525_v3, %v2526_v22  ;;  %v2441_v8 = vrot.slane %v2219_v11, 1  ;;  %v4811_v25 = vpop.f32.mrb[130].mxu1  ;;  %v2223_v43 = vpop.f32.mrb[131].mxu0 }
 0x202   : > { %v2823_v6 = vmax.f32 %v2791_v20, 0.0  ;;  %v2824_v36 = vmax.f32 %v2792_v44, 0.0  ;;  %v2755_v4 = vmul.f32 %v4684_v48, %v2652_v55  ;;  %v2589_v21 = vadd.f32 %v2563_v31, %v4624_v7  ;;  %v2357_v13 = vpop.f32.mrb[131].mxu1 }
 0x203   : > { %v2758_v32 = vmul.f32 %v4684_v48, %v2655_v53  ;;  %v2590_v17 = vadd.f32 %v2562_v42, %v4638_v60  ;;  %v2456_v57 = vsel %vm1043_vm2, %v2440_v0, %v2441_v8  ;;  %v2529_v35 = vrot.slane %v2354_v19, 2 }
 0x204   : > { %2855 = vst [vmem:[%s4721_s16 + $0x40] sm:$0xff] %v2823_v6  ;;  %2856 = vst [vmem:[%s4721_s16 + $0x48] sm:$0xff] %v2824_v36  ;;  %v2794_v3 = vadd.f32 %v4694_v62, %v2755_v4  ;;  %v2653_v56 = vadd.f32 %v2589_v21, %v5098_v23  ;;  %v4824_v15 = vadd.f32 %v2456_v57, %v4761_v10  ;;  %v2532_v7 = vrot.slane %v4811_v25, 2 }
 0x205   : > { %v2797_v22 = vadd.f32 %v4694_v62, %v2758_v32  ;;  %v2654_v60 = vadd.f32 %v2590_v17, %v5099_v51  ;;  %v2560_v0 = vsel %vm1140_vm3, %v2528_v40, %v2529_v35  ;;  %v2442_v11 = vrot.slane %v2223_v43, 1 }
 0x206   : > { %v2826_v20 = vmax.f32 %v2794_v3, 0.0  ;;  %v2756_v44 = vmul.f32 %v4684_v48, %v2653_v56  ;;  %v2592_v55 = vadd.f32 %v2560_v0, %v4667_v12  ;;  %v2557_v10 = vsel %vm1140_vm3, %v2531_v2, %v2532_v7  ;;  %v2227_v19 = vpop.f32.mrb[132].mxu0 }
 0x207   : > { %v2829_v53 = vmax.f32 %v2797_v22, 0.0  ;;  %v2757_v42 = vmul.f32 %v4684_v48, %v2654_v60  ;;  %v2595_v31 = vadd.f32 %v2557_v10, %v4719_v28  ;;  %v2455_v25 = vsel %vm1043_vm2, %v2441_v8, %v2442_v11  ;;  %v4839_v40 = vpop.f32.mrb[132].mxu1  ;;  %v2229_v43 = vpop.f32.mrb[133].mxu0 }
 0x208   : > { %2858 = vst [vmem:[%s4721_s16 + $0x58] sm:$0xff] %v2826_v20  ;;  %v2795_v6 = vadd.f32 %v4694_v62, %v2756_v44  ;;  %v2656_v12 = vadd.f32 %v2592_v55, %v4509_v29  ;;  %v4844_v36 = vadd.f32 %v2455_v25, %v2217_v1  ;;  %v2530_v4 = vrot.slane %v2357_v13, 2  ;;  %v2370_v21 = vpop.f32.mrb[133].mxu1  ;;  %v4846_v32 = vpop.f32.mrb[134].mxu0 }
 0x209   : > { %2861 = vst [vmem:[%s4721_s16 + $0x70] sm:$0xff] %v2829_v53  ;;  %v2796_v28 = vadd.f32 %v4694_v62, %v2757_v42  ;;  %v2659_v8 = vadd.f32 %v2595_v31, %v4534_v38  ;;  %v2535_v17 = vrot.slane %v4839_v40, 2  ;;  %v2443_v57 = vrot.slane %v2229_v43, 1  ;;  %v4852_v3 = vpop.f32.mrb[134].mxu1  ;;  %v2233_v23 = vpop.f32.mrb[135].mxu0 }
 0x20a   : > { %v2827_v29 = vmax.f32 %v2795_v6, 0.0  ;;  %v2759_v1 = vmul.f32 %v4684_v48, %v2656_v12  ;;  %v2558_v13 = vsel %vm1140_vm3, %v2530_v4, %v2531_v2  ;;  %v2559_v56 = vsel %vm1140_vm3, %v2529_v35, %v2530_v4  ;;  %v2373_v22 = vpop.f32.mrb[135].mxu1 }
 0x20b   : > { %v2828_v51 = vmax.f32 %v2796_v28, 0.0  ;;  %v2762_v38 = vmul.f32 %v4684_v48, %v2659_v8  ;;  %v2593_v60 = vadd.f32 %v2559_v56, %v4686_v63  ;;  %v2594_v0 = vadd.f32 %v2558_v13, %v4706_v9 }
 0x20c   : > { %2859 = vst [vmem:[%s4721_s16 + $0x60] sm:$0xff] %v2827_v29  ;;  %v2798_v20 = vadd.f32 %v4694_v62, %v2759_v1  ;;  %v2454_v44 = vsel %vm1043_vm2, %v2442_v11, %v2443_v57  ;;  %v2533_v55 = vrot.slane %v2370_v21, 2  ;;  %v2536_v2 = vrot.slane %v4852_v3, 2 }
 0x20d   : > { %2860 = vst [vmem:[%s4721_s16 + $0x68] sm:$0xff] %v2828_v51  ;;  %v2801_v35 = vadd.f32 %v4694_v62, %v2762_v38  ;;  %v2657_v10 = vadd.f32 %v2593_v60, %v4514_v50  ;;  %v2658_v53 = vadd.f32 %v2594_v0, %v4529_v46  ;;  %v4872_v63 = vadd.f32 %v2454_v44, %v4804_v47 }
 0x20e   : > { %v2830_v9 = vmax.f32 %v2798_v20, 0.0  ;;  %v2556_v42 = vsel %vm1140_vm3, %v2532_v7, %v2533_v55  ;;  %v2553_v11 = vsel %vm1140_vm3, %v2535_v17, %v2536_v2  ;;  %v2444_v31 = vrot.slane %v2233_v23, 1  ;;  %v2237_v25 = vpop.f32.mrb[136].mxu0 }
 0x20f   : > { %v2833_v40 = vmax.f32 %v2801_v35, 0.0  ;;  %v2760_v43 = vmul.f32 %v4684_v48, %v2657_v10  ;;  %v2761_v50 = vmul.f32 %v4684_v48, %v2658_v53  ;;  %v2596_v46 = vadd.f32 %v2556_v42, %v4745_v16  ;;  %v4881_v6 = vpop.f32.mrb[136].mxu1  ;;  %v2239_v47 = vpop.f32.mrb[137].mxu0 }
 0x210   : > { %2862 = vst [vmem:[%s4721_s16 + $0x78] sm:$0xff] %v2830_v9  ;;  %v2599_v12 = vadd.f32 %v2553_v11, %v4795_v24  ;;  %v2453_v7 = vsel %vm1043_vm2, %v2443_v57, %v2444_v31  ;;  %v2534_v4 = vrot.slane %v2373_v22, 2  ;;  %v2539_v21 = vrot.slane %v4881_v6, 2  ;;  %v4888_v28 = vpop.f32.mrb[137].mxu1  ;;  %v4890_v8 = vpop.f32.mrb[138].mxu0 }
 0x211   : > { %2865 = vst [vmem:[%s4721_s16 + $0x90] sm:$0xff] %v2833_v40  ;;  %v2799_v3 = vadd.f32 %v4694_v62, %v2760_v43  ;;  %v2800_v16 = vadd.f32 %v4694_v62, %v2761_v50  ;;  %v2660_v23 = vadd.f32 %v2596_v46, %v4549_v14  ;;  %v2507_v29 = vadd.f32 %v2453_v7, %v2227_v19  ;;  %v4896_v24 = vpop.f32.mrb[138].mxu1  ;;  %v2243_v57 = vpop.f32.mrb[139].mxu0 }
 0x212   : > { %v2663_v1 = vadd.f32 %v2599_v12, %v4574_v58  ;;  %v2554_v13 = vsel %vm1140_vm3, %v2534_v4, %v2535_v17  ;;  %v2555_v56 = vsel %vm1140_vm3, %v2533_v55, %v2534_v4  ;;  %v2445_v22 = vrot.slane %v2239_v47, 1  ;;  %v2389_v51 = vpop.f32.mrb[139].mxu1 }
 0x213   : > { %v2831_v38 = vmax.f32 %v2799_v3, 0.0  ;;  %v2832_v60 = vmax.f32 %v2800_v16, 0.0  ;;  %v2763_v14 = vmul.f32 %v4684_v48, %v2660_v23  ;;  %v2597_v19 = vadd.f32 %v2555_v56, %v4756_v37 }
 0x214   : > { %v2766_v0 = vmul.f32 %v4684_v48, %v2663_v1  ;;  %v2598_v20 = vadd.f32 %v2554_v13, %v4782_v41  ;;  %v2452_v58 = vsel %vm1043_vm2, %v2444_v31, %v2445_v22  ;;  %v2537_v17 = vrot.slane %v4888_v28, 2 }
 0x215   : > { %2863 = vst [vmem:[%s4721_s16 + $0x80] sm:$0xff] %v2831_v38  ;;  %2864 = vst [vmem:[%s4721_s16 + $0x88] sm:$0xff] %v2832_v60  ;;  %v2802_v44 = vadd.f32 %v4694_v62, %v2763_v14  ;;  %v2661_v55 = vadd.f32 %v2597_v19, %v4554_v49  ;;  %v2508_v35 = vadd.f32 %v2452_v58, %v4846_v32  ;;  %v2540_v10 = vrot.slane %v4896_v24, 2 }
 0x216   : > { %v2805_v37 = vadd.f32 %v4694_v62, %v2766_v0  ;;  %v2662_v53 = vadd.f32 %v2598_v20, %v4569_v39  ;;  %v2552_v41 = vsel %vm1140_vm3, %v2536_v2, %v2537_v17  ;;  %v2446_v9 = vrot.slane %v2243_v57, 1  ;;  %v4920_v42 = vpop.f32.mrb[140].mxu0 }
 0x217   : > { %v2834_v11 = vmax.f32 %v2802_v44, 0.0  ;;  %v2764_v31 = vmul.f32 %v4684_v48, %v2661_v55  ;;  %v2600_v49 = vadd.f32 %v2552_v41, %v4824_v15  ;;  %v2549_v32 = vsel %vm1140_vm3, %v2539_v21, %v2540_v10  ;;  %v3344_v40 = vpop.f32.mrb[140].mxu1  ;;  %v2249_v43 = vpop.f32.mrb[141].mxu0 }
 0x218   : > { %v2837_v50 = vmax.f32 %v2805_v37, 0.0  ;;  %v2765_v39 = vmul.f32 %v4684_v48, %v2662_v53  ;;  %v2603_v46 = vadd.f32 %v2549_v32, %v2507_v29  ;;  %v2451_v2 = vsel %vm1043_vm2, %v2445_v22, %v2446_v9  ;;  %v2402_v6 = vpop.f32.mrb[141].mxu1  ;;  %v2251_v47 = vpop.f32.mrb[142].mxu0 }
 0x219   : > { %2866 = vst [vmem:[%s4721_s16 + $0x98] sm:$0xff] %v2834_v11  ;;  %v2803_v12 = vadd.f32 %v4694_v62, %v2764_v31  ;;  %v2664_v15 = vadd.f32 %v2600_v49, %v4589_v45  ;;  %v2509_v7 = vadd.f32 %v2451_v2, %v2237_v25  ;;  %v2538_v4 = vrot.slane %v2389_v51, 2  ;;  %v3345_v28 = vpop.f32.mrb[142].mxu1  ;;  %v2253_v3 = vpop.f32.mrb[143].mxu0 }
 0x21a   : > { %2869 = vst [vmem:[%s4721_s16 + $0xb0] sm:$0xff] %v2837_v50  ;;  %v2804_v16 = vadd.f32 %v4694_v62, %v2765_v39  ;;  %v2667_v23 = vadd.f32 %v2603_v46, %v4614_v34  ;;  %v2543_v29 = vrot.slane %v3344_v40, 2  ;;  %v2447_v24 = vrot.slane %v2249_v43, 1  ;;  %v2405_v57 = vpop.f32.mrb[143].mxu1 }
 0x21b   : > { %v2835_v1 = vmax.f32 %v2803_v12, 0.0  ;;  %v2767_v13 = vmul.f32 %v4684_v48, %v2664_v15  ;;  %v2550_v45 = vsel %vm1140_vm3, %v2538_v4, %v2539_v21  ;;  %v2551_v25 = vsel %vm1140_vm3, %v2537_v17, %v2538_v4 }
 0x21c   : > { %v2836_v56 = vmax.f32 %v2804_v16, 0.0  ;;  %v2770_v22 = vmul.f32 %v4684_v48, %v2667_v23  ;;  %v2601_v51 = vadd.f32 %v2551_v25, %v4844_v36  ;;  %v2602_v34 = vadd.f32 %v2550_v45, %v4872_v63 }
 0x21d   : > { %2867 = vst [vmem:[%s4721_s16 + $0xa0] sm:$0xff] %v2835_v1  ;;  %v2806_v38 = vadd.f32 %v4694_v62, %v2767_v13  ;;  %v2450_v60 = vsel %vm1043_vm2, %v2446_v9, %v2447_v24  ;;  %v2541_v14 = vrot.slane %v2402_v6, 2  ;;  %v2544_v19 = vrot.slane %v3345_v28, 2  ;;  %v5100_v9 = vld [vmem:[#allocation17_spill] sm:$0xff] }
 0x21e   : > { %2868 = vst [vmem:[%s4721_s16 + $0xa8] sm:$0xff] %v2836_v56  ;;  %v2809_v21 = vadd.f32 %v4694_v62, %v2770_v22  ;;  %v2665_v0 = vadd.f32 %v2601_v51, %v4594_v61  ;;  %v2666_v20 = vadd.f32 %v2602_v34, %v4609_v59  ;;  %v2510_v36 = vadd.f32 %v2450_v60, %v4890_v8 }
 0x21f   : > { %v2838_v63 = vmax.f32 %v2806_v38, 0.0  ;;  %v2548_v58 = vsel %vm1140_vm3, %v2540_v10, %v2541_v14  ;;  %v2545_v17 = vsel %vm1140_vm3, %v2543_v29, %v2544_v19  ;;  %v2576_v44 = vsel %vm1140_vm3, %v2544_v19, %v2513_v54 }
 0x220   : > { %v2841_v55 = vmax.f32 %v2809_v21, 0.0  ;;  %v2768_v61 = vmul.f32 %v4684_v48, %v2665_v0  ;;  %v2769_v59 = vmul.f32 %v4684_v48, %v2666_v20  ;;  %v2604_v37 = vadd.f32 %v2548_v58, %v2508_v35 }
 0x221   : > { %2870 = vst [vmem:[%s4721_s16 + $0xb8] sm:$0xff] %v2838_v63  ;;  %v2448_v8 = vrot.slane %v2253_v3, 1  ;;  %v2542_v53 = vrot.slane %v2405_v57, 2  ;;  %v5101_v11 = vrot.slane %v5100_v9, 1 }
 0x222   : > { %2873 = vst [vmem:[%s4721_s16 + $0xd0] sm:$0xff] %v2841_v55  ;;  %v2807_v10 = vadd.f32 %v4694_v62, %v2768_v61  ;;  %v2808_v27 = vadd.f32 %v4694_v62, %v2769_v59  ;;  %v2668_v41 = vadd.f32 %v2604_v37, %v4629_v33 }
 0x223   : > { %v2449_v54 = vsel %vm1043_vm2, %v2447_v24, %v2448_v8  ;;  %v2480_v35 = vsel %vm1043_vm2, %v2448_v8, %v5101_v11  ;;  %v2546_v31 = vsel %vm1140_vm3, %v2542_v53, %v2543_v29  ;;  %v2547_v49 = vsel %vm1140_vm3, %v2541_v14, %v2542_v53 }
 0x224   : > { %v2839_v32 = vmax.f32 %v2807_v10, 0.0  ;;  %v2840_v40 = vmax.f32 %v2808_v27, 0.0  ;;  %v2771_v33 = vmul.f32 %v4684_v48, %v2668_v41  ;;  %v2511_v43 = vadd.f32 %v2449_v54, %v4920_v42 }
 0x225   : > { %v2512_v50 = vadd.f32 %v2480_v35, %v2251_v47  ;;  %v2605_v39 = vadd.f32 %v2547_v49, %v2509_v7  ;;  %v2606_v46 = vadd.f32 %v2546_v31, %v2510_v36 }
 0x226   : > { %2871 = vst [vmem:[%s4721_s16 + $0xc0] sm:$0xff] %v2839_v32  ;;  %2872 = vst [vmem:[%s4721_s16 + $0xc8] sm:$0xff] %v2840_v40  ;;  %v2810_v2 = vadd.f32 %v4694_v62, %v2771_v33  ;;  %v2607_v6 = vadd.f32 %v2545_v17, %v2511_v43 }
 0x227   : > { %v2608_v5 = vadd.f32 %v2576_v44, %v2512_v50  ;;  %v2669_v12 = vadd.f32 %v2605_v39, %v4634_v18  ;;  %v2670_v15 = vadd.f32 %v2606_v46, %v4657_v26 }
 0x228   : > { %v2842_v4 = vmax.f32 %v2810_v2, 0.0  ;;  %v2671_v28 = vadd.f32 %v2607_v6, %v4660_v52 }
 0x229   : > { %v2672_v42 = vadd.f32 %v2608_v5, %v4663_v30  ;;  %v2772_v47 = vmul.f32 %v4684_v48, %v2669_v12  ;;  %v2773_v7 = vmul.f32 %v4684_v48, %v2670_v15 }
 0x22a   : > { %2874 = vst [vmem:[%s4721_s16 + $0xd8] sm:$0xff] %v2842_v4  ;;  %v2774_v3 = vmul.f32 %v4684_v48, %v2671_v28 }
 0x22b   : > { %v2775_v18 = vmul.f32 %v4684_v48, %v2672_v42  ;;  %v2811_v26 = vadd.f32 %v4694_v62, %v2772_v47  ;;  %v2812_v52 = vadd.f32 %v4694_v62, %v2773_v7 }
 0x22c   : > { %v2813_v30 = vadd.f32 %v4694_v62, %v2774_v3 }
 0x22d   : > { %v2814_v16 = vadd.f32 %v4694_v62, %v2775_v18  ;;  %v2843_v23 = vmax.f32 %v2811_v26, 0.0  ;;  %v2844_v29 = vmax.f32 %v2812_v52, 0.0 }
 0x22e   : > { %v2845_v24 = vmax.f32 %v2813_v30, 0.0 }
 0x22f   : > { %v2846_v48 = vmax.f32 %v2814_v16, 0.0  ;;  %2875 = vst [vmem:[%s4721_s16 + $0xe0] sm:$0xff] %v2843_v23  ;;  %2876 = vst [vmem:[%s4721_s16 + $0xe8] sm:$0xff] %v2844_v29 }
 0x230   : > { %2877 = vst [vmem:[%s4721_s16 + $0xf0] sm:$0xff] %v2845_v24 }
 0x231   : > { %2878 = vst [vmem:[%s4721_s16 + $0xf8] sm:$0xff] %v2846_v48 }
 0x232   : > { %3463 = shalt.err (!%p3460_p9)
}
 0x233   : > { %s3464_s15 = scalar_lea.hbm %s5000_s8, 4096  ;;  %s3468_s26 = scalar_lea.hbm %s5068_s5, 16384 }
 0x234   : > { %p3465_p10 = scmp.ne.s32.totalorder %s5000_s8, %s3464_s15  ;;  %p3469_p13 = scmp.lt.u32.totalorder %s5000_s8, %s5068_s5 }
 0x235   : > { %p3470_p0 = scmp.lt.u32.totalorder %s3468_s26, %s3464_s15  ;;  %p3472_p2 = scmp.lt.u32.totalorder %s3464_s15, %s5000_s8 }
 0x236   : > { %p3466_p11 = pnand %p3465_p10, %p3632_p3 }
 0x237   : > { %p3471_p1 = por %p3470_p0, %p3469_p13 }
 0x238   : > { %p3467_p12 = pneg %p3466_p11 }
 0x239   : > { %p3473_p4 = por %p3472_p2, %p3471_p1 }
 0x23b   : > { %p3474_p5 = pnand %p3473_p4, %p3467_p12 }
 0x23d   : > { %3477 = shalt.err (!%p3474_p5)
}
 0x23e   : > { %s3549_s30 = smov 128   ;;  %s3550_s9 = smov 8  }
 0x23f   : > { %3352 = dma.vmem_to_hbm [thread:$0]  (%p3632_p3), %s5003_s14, 4096, %s5000_s8, %s5011_s21, %s3549_s30, %s3549_s30, %s3550_s9  }
 0x240 PF: > { %p3358_p6 = scmp.ge.s32.totalorder %s3544_s25, 2  ;;  %s2911_s10 = sand.u32 1, %s3516_s18  }
 0x241   : > { %s2912_s12 = scalar_lea.sflag [#allocation5], %s2911_s10 }
 0x242   : > { %p3355_p7 = pnand %p3358_p6, %p3641_p8 }
 0x244   : > { %3511 = dma.done.wait (!%p3355_p7), %s2912_s12, 4096  }
 0x245   : > { %3513 = vsyncadd (!%p3355_p7), %s2912_s12, 4294963200  ;;  %s18_s25 = sadd.s32 1, %s3544_s25   ;;  %s5102_s18 = smov %s3520_s19 }
 0x246   : > { %p15_p9 = scmp.ge.s32.totalorder %s18_s25, 6   ;;  %s5103_s19 = smov %s3524_s20 }
 0x247   : > { %s5104_s20 = smov %s3650_s11  ;;  %s5105_s21 = smov %s3536_s23 }
 0x248   : > { %s5106_s22 = smov %s3540_s24  ;;  %s5107_s23 = smov %s5110_s28 }
 0x249   : > { %s5108_s24 = smov %s5114_s29  ;;  %17 = sbr.rel (!%p15_p9) target bundleno = 5 (0x5), region = 89 }
 0x250   :  { %2917 = vsyncpa [#allocation5], 1 }
 0x251   :  { %2919 = vsyncpa [#allocation5 + $0x1], 1 }

</bundles_post_ra>
